<compile_context>
chip_gen: v6e
topology: v6e:2x2x1
jax: 0.10.0
libtpu: 0.0.40
codegen_flags: <defaults>
</compile_context>

<pallas_src>
import jax
import jax.numpy as jnp
import numpy as np
from jax.experimental import pallas as pl
from jax.experimental.pallas import tpu as pltpu

# Synthetic env sizes (env.get_vars() surrogate) — small, deterministic.
STATE_SIZE = 16                    # StateSize (must be even for convSize)
C_ACTION_SIZE = 4                  # CActionSize
ACTION_SIZE = 2 * C_ACTION_SIZE    # ActionSize = 8
LSTM_H = 10                        # lstm_i_dim == lstm_h_dim == 10
LSTM_LAYERS = 10                   # lstm_N_layer == 10
CONV_SIZE = STATE_SIZE // 2        # convSize = 8
BATCH = 2
GATES = 4 * LSTM_H                 # fused gate width (i|f|g|o) = 40


def drqn_kernel(x_ref, h0_ref, c0_ref,
                flat1_w_ref, flat1_b_ref,
                w_ih_ref, w_hh_ref, b_ref,
                fc1_w_ref, fc1_b_ref, fc2_w_ref, fc2_b_ref,
                out_ref, new_h_ref, new_c_ref):
    H = LSTM_H
    x = x_ref[...]                                                     # (B, S)

    # h2 = flat1(x)  -> becomes the LSTM input for the single time step.
    layer_in = (jnp.dot(x, flat1_w_ref[...],
                        preferred_element_type=jnp.float32)
                + flat1_b_ref[...])                                    # (B, H)

    # Hoisted recurrent-side contributions: seq_len == 1 means each layer's
    # h-side term uses only the *initial* h0[l], independent of the serial
    # layer recurrence, so compute all of them up front (they pipeline
    # back-to-back through the MXU instead of sitting on the critical chain).
    h_gates = [jnp.dot(h0_ref[l], w_hh_ref[l],
                       preferred_element_type=jnp.float32)             # (B, 4H)
               for l in range(LSTM_LAYERS)]

    # 10-layer LSTM, one time step per layer. Gate order matches PyTorch:
    # i, f, g, o packed along the last axis of the fused weights/bias.
    hs, cs = [], []
    for l in range(LSTM_LAYERS):
        # Single fused gate matmul on the (serial) x-side, plus the hoisted
        # h-side term and the pre-summed (b_ih + b_hh) bias.
        gates = (jnp.dot(layer_in, w_ih_ref[l],
                         preferred_element_type=jnp.float32)
                 + h_gates[l] + b_ref[l])                              # (B, 4H)

        sig = jax.nn.sigmoid(gates)       # one EUP pass for i/f/o
        tnh = jnp.tanh(gates)             # one EUP pass for g
        i_g = sig[:, 0 * H:1 * H]
        f_g = sig[:, 1 * H:2 * H]
        g_g = tnh[:, 2 * H:3 * H]
        o_g = sig[:, 3 * H:4 * H]

        c_new = f_g * c0_ref[l] + i_g * g_g
        h_new = o_g * jnp.tanh(c_new)

        hs.append(h_new)
        cs.append(c_new)
        layer_in = h_new                                               # feeds next layer

    # Write new hidden/cell states once each (instead of 20 masked stores).
    new_h_ref[...] = jnp.stack(hs, axis=0)                             # (L, B, H)
    new_c_ref[...] = jnp.stack(cs, axis=0)                             # (L, B, H)

    # h4 = relu(fc1(h3)); h5 = fc2(h4)
    h4 = jnp.maximum(jnp.dot(layer_in, fc1_w_ref[...],
                             preferred_element_type=jnp.float32)
                     + fc1_b_ref[...], 0.0)                            # (B, convSize)
    out_ref[...] = (jnp.dot(h4, fc2_w_ref[...],
                            preferred_element_type=jnp.float32)
                    + fc2_b_ref[...])                                  # (B, ActionSize)


def init_params(key):
    """Deterministic PyTorch-style uniform(-1/sqrt(fan_in), +) init.

    All Linear / LSTM weights are stored pre-transposed as (in, out) so the
    kernel computes y = x @ W + b.  LSTM gate weights are fused along the
    output axis in PyTorch order i|f|g|o: (L, H, 4H); the two LSTM biases are
    pre-summed into a single (L, 1, 4H)."""
    ks = jax.random.split(key, 10)

    def u(k, shape, fan_in):
        bound = 1.0 / np.sqrt(fan_in)
        return jax.random.uniform(k, shape, jnp.float32, -bound, bound)

    b_ih = u(ks[4], (LSTM_LAYERS, 1, GATES), LSTM_H)
    b_hh = u(ks[5], (LSTM_LAYERS, 1, GATES), LSTM_H)

    return {
        "flat1_w": u(ks[0], (STATE_SIZE, LSTM_H), STATE_SIZE),
        "flat1_b": u(ks[1], (1, LSTM_H), STATE_SIZE),
        "w_ih":    u(ks[2], (LSTM_LAYERS, LSTM_H, GATES), LSTM_H),
        "w_hh":    u(ks[3], (LSTM_LAYERS, LSTM_H, GATES), LSTM_H),
        "b":       b_ih + b_hh,                     # pre-summed bias
        "fc1_w":   u(ks[6], (LSTM_H, CONV_SIZE), LSTM_H),
        "fc1_b":   u(ks[7], (1, CONV_SIZE), LSTM_H),
        "fc2_w":   u(ks[8], (CONV_SIZE, ACTION_SIZE), CONV_SIZE),
        "fc2_b":   u(ks[9], (1, ACTION_SIZE), CONV_SIZE),
    }


@jax.jit
def drqn_forward(x, hidden, params):
    h0, c0 = hidden
    vmem = lambda: pl.BlockSpec(memory_space=pltpu.MemorySpace.VMEM)

    out_shape = (
        jax.ShapeDtypeStruct((BATCH, ACTION_SIZE), jnp.float32),
        jax.ShapeDtypeStruct((LSTM_LAYERS, BATCH, LSTM_H), jnp.float32),
        jax.ShapeDtypeStruct((LSTM_LAYERS, BATCH, LSTM_H), jnp.float32),
    )
    h5, new_h, new_c = pl.pallas_call(
        drqn_kernel,
        out_shape=out_shape,
        in_specs=[vmem() for _ in range(12)],
        out_specs=(vmem(), vmem(), vmem()),
    )(x, h0, c0,
      params["flat1_w"], params["flat1_b"],
      params["w_ih"], params["w_hh"], params["b"],
      params["fc1_w"], params["fc1_b"], params["fc2_w"], params["fc2_b"])

    # PyTorch returns h5 with the seq_len=1 axis from unsqueeze(0).
    return h5[None, ...], (new_h, new_c)


def drqn_ref(x, h0, c0, p):
    """Pure-JAX reference of the same math, for validation."""
    H = LSTM_H
    layer_in = x @ p["flat1_w"] + p["flat1_b"]
    new_h, new_c = [], []
    for l in range(LSTM_LAYERS):
        hp, cp = h0[l], c0[l]
        gates = layer_in @ p["w_ih"][l] + hp @ p["w_hh"][l] + p["b"][l]
        i_g = jax.nn.sigmoid(gates[:, 0 * H:1 * H])
        f_g = jax.nn.sigmoid(gates[:, 1 * H:2 * H])
        g_g = jnp.tanh(gates[:, 2 * H:3 * H])
        o_g = jax.nn.sigmoid(gates[:, 3 * H:4 * H])
        cn = f_g * cp + i_g * g_g
        hn = o_g * jnp.tanh(cn)
        new_h.append(hn)
        new_c.append(cn)
        layer_in = hn
    h4 = jnp.maximum(layer_in @ p["fc1_w"] + p["fc1_b"], 0.0)
    h5 = h4 @ p["fc2_w"] + p["fc2_b"]
    return h5, jnp.stack(new_h), jnp.stack(new_c)


if __name__ == "__main__":
    key = jax.random.PRNGKey(0)
    kx, kh, kc, kp = jax.random.split(key, 4)

    x = jax.random.normal(kx, (BATCH, STATE_SIZE), jnp.float32)
    h0 = jax.random.normal(kh, (LSTM_LAYERS, BATCH, LSTM_H), jnp.float32)
    c0 = jax.random.normal(kc, (LSTM_LAYERS, BATCH, LSTM_H), jnp.float32)
    params = init_params(kp)

    h5, (new_h, new_c) = drqn_forward(x, (h0, c0), params)
    jax.block_until_ready((h5, new_h, new_c))

    r5, rh, rc = drqn_ref(x, h0, c0, params)
    np.testing.assert_allclose(np.asarray(h5[0]), np.asarray(r5), rtol=1e-5, atol=1e-5)
    np.testing.assert_allclose(np.asarray(new_h), np.asarray(rh), rtol=1e-5, atol=1e-5)
    np.testing.assert_allclose(np.asarray(new_c), np.asarray(rc), rtol=1e-5, atol=1e-5)

    print("KERNEL_OK")
</pallas_src>

<mosaic_0001>
module attributes {stable_mosaic.version = 11 : i64} {
  func.func @drqn_kernel(%arg0: memref<2x16xf32, #tpu.memory_space<vmem>>, %arg1: memref<10x2x10xf32, #tpu.memory_space<vmem>>, %arg2: memref<10x2x10xf32, #tpu.memory_space<vmem>>, %arg3: memref<16x10xf32, #tpu.memory_space<vmem>>, %arg4: memref<1x10xf32, #tpu.memory_space<vmem>>, %arg5: memref<10x10x40xf32, #tpu.memory_space<vmem>>, %arg6: memref<10x10x40xf32, #tpu.memory_space<vmem>>, %arg7: memref<10x1x40xf32, #tpu.memory_space<vmem>>, %arg8: memref<10x8xf32, #tpu.memory_space<vmem>>, %arg9: memref<1x8xf32, #tpu.memory_space<vmem>>, %arg10: memref<8x8xf32, #tpu.memory_space<vmem>>, %arg11: memref<1x8xf32, #tpu.memory_space<vmem>>, %arg12: memref<2x8xf32, #tpu.memory_space<vmem>>, %arg13: memref<10x2x10xf32, #tpu.memory_space<vmem>>, %arg14: memref<10x2x10xf32, #tpu.memory_space<vmem>>) attributes {dimension_semantics = [], scalar_prefetch = 0 : i64, scratch_operands = 0 : i64, tpu.core_type = #tpu.core_type<tc>} {
    %c0 = arith.constant 0 : index
    %c0_0 = arith.constant 0 : index
    %0 = vector.load %arg0[%c0, %c0_0] : memref<2x16xf32, #tpu.memory_space<vmem>>, vector<2x16xf32>
    %c0_1 = arith.constant 0 : index
    %c0_2 = arith.constant 0 : index
    %1 = vector.load %arg3[%c0_1, %c0_2] : memref<16x10xf32, #tpu.memory_space<vmem>>, vector<16x10xf32>
    %cst = arith.constant dense<0.000000e+00> : vector<2x10xf32>
    %2 = tpu.matmul %0, %1, %cst {dimension_numbers = #tpu.dot_dimension_numbers<[1], [0], [0], [1], [0, 0, 1, 1], [], []>} : vector<2x16xf32>, vector<16x10xf32>, vector<2x10xf32> -> vector<2x10xf32>
    %c0_3 = arith.constant 0 : index
    %c0_4 = arith.constant 0 : index
    %3 = vector.load %arg4[%c0_3, %c0_4] : memref<1x10xf32, #tpu.memory_space<vmem>>, vector<1x10xf32>
    %4 = vector.broadcast %3 : vector<1x10xf32> to vector<2x10xf32>
    %5 = arith.addf %2, %4 : vector<2x10xf32>
    %c0_5 = arith.constant 0 : index
    %c0_6 = arith.constant 0 : index
    %c0_7 = arith.constant 0 : index
    %6 = vector.load %arg1[%c0_5, %c0_6, %c0_7] : memref<10x2x10xf32, #tpu.memory_space<vmem>>, vector<1x2x10xf32>
    %7 = vector.shape_cast %6 : vector<1x2x10xf32> to vector<2x10xf32>
    %c0_8 = arith.constant 0 : index
    %c0_9 = arith.constant 0 : index
    %c0_10 = arith.constant 0 : index
    %8 = vector.load %arg6[%c0_8, %c0_9, %c0_10] : memref<10x10x40xf32, #tpu.memory_space<vmem>>, vector<1x10x40xf32>
    %9 = vector.shape_cast %8 : vector<1x10x40xf32> to vector<10x40xf32>
    %cst_11 = arith.constant dense<0.000000e+00> : vector<2x40xf32>
    %10 = tpu.matmul %7, %9, %cst_11 {dimension_numbers = #tpu.dot_dimension_numbers<[1], [0], [0], [1], [0, 0, 1, 1], [], []>} : vector<2x10xf32>, vector<10x40xf32>, vector<2x40xf32> -> vector<2x40xf32>
    %c1 = arith.constant 1 : index
    %c0_12 = arith.constant 0 : index
    %c0_13 = arith.constant 0 : index
    %11 = vector.load %arg1[%c1, %c0_12, %c0_13] : memref<10x2x10xf32, #tpu.memory_space<vmem>>, vector<1x2x10xf32>
    %12 = vector.shape_cast %11 : vector<1x2x10xf32> to vector<2x10xf32>
    %c1_14 = arith.constant 1 : index
    %c0_15 = arith.constant 0 : index
    %c0_16 = arith.constant 0 : index
    %13 = vector.load %arg6[%c1_14, %c0_15, %c0_16] : memref<10x10x40xf32, #tpu.memory_space<vmem>>, vector<1x10x40xf32>
    %14 = vector.shape_cast %13 : vector<1x10x40xf32> to vector<10x40xf32>
    %cst_17 = arith.constant dense<0.000000e+00> : vector<2x40xf32>
    %15 = tpu.matmul %12, %14, %cst_17 {dimension_numbers = #tpu.dot_dimension_numbers<[1], [0], [0], [1], [0, 0, 1, 1], [], []>} : vector<2x10xf32>, vector<10x40xf32>, vector<2x40xf32> -> vector<2x40xf32>
    %c2 = arith.constant 2 : index
    %c0_18 = arith.constant 0 : index
    %c0_19 = arith.constant 0 : index
    %16 = vector.load %arg1[%c2, %c0_18, %c0_19] : memref<10x2x10xf32, #tpu.memory_space<vmem>>, vector<1x2x10xf32>
    %17 = vector.shape_cast %16 : vector<1x2x10xf32> to vector<2x10xf32>
    %c2_20 = arith.constant 2 : index
    %c0_21 = arith.constant 0 : index
    %c0_22 = arith.constant 0 : index
    %18 = vector.load %arg6[%c2_20, %c0_21, %c0_22] : memref<10x10x40xf32, #tpu.memory_space<vmem>>, vector<1x10x40xf32>
    %19 = vector.shape_cast %18 : vector<1x10x40xf32> to vector<10x40xf32>
    %cst_23 = arith.constant dense<0.000000e+00> : vector<2x40xf32>
    %20 = tpu.matmul %17, %19, %cst_23 {dimension_numbers = #tpu.dot_dimension_numbers<[1], [0], [0], [1], [0, 0, 1, 1], [], []>} : vector<2x10xf32>, vector<10x40xf32>, vector<2x40xf32> -> vector<2x40xf32>
    %c3 = arith.constant 3 : index
    %c0_24 = arith.constant 0 : index
    %c0_25 = arith.constant 0 : index
    %21 = vector.load %arg1[%c3, %c0_24, %c0_25] : memref<10x2x10xf32, #tpu.memory_space<vmem>>, vector<1x2x10xf32>
    %22 = vector.shape_cast %21 : vector<1x2x10xf32> to vector<2x10xf32>
    %c3_26 = arith.constant 3 : index
    %c0_27 = arith.constant 0 : index
    %c0_28 = arith.constant 0 : index
    %23 = vector.load %arg6[%c3_26, %c0_27, %c0_28] : memref<10x10x40xf32, #tpu.memory_space<vmem>>, vector<1x10x40xf32>
    %24 = vector.shape_cast %23 : vector<1x10x40xf32> to vector<10x40xf32>
    %cst_29 = arith.constant dense<0.000000e+00> : vector<2x40xf32>
    %25 = tpu.matmul %22, %24, %cst_29 {dimension_numbers = #tpu.dot_dimension_numbers<[1], [0], [0], [1], [0, 0, 1, 1], [], []>} : vector<2x10xf32>, vector<10x40xf32>, vector<2x40xf32> -> vector<2x40xf32>
    %c4 = arith.constant 4 : index
    %c0_30 = arith.constant 0 : index
    %c0_31 = arith.constant 0 : index
    %26 = vector.load %arg1[%c4, %c0_30, %c0_31] : memref<10x2x10xf32, #tpu.memory_space<vmem>>, vector<1x2x10xf32>
    %27 = vector.shape_cast %26 : vector<1x2x10xf32> to vector<2x10xf32>
    %c4_32 = arith.constant 4 : index
    %c0_33 = arith.constant 0 : index
    %c0_34 = arith.constant 0 : index
    %28 = vector.load %arg6[%c4_32, %c0_33, %c0_34] : memref<10x10x40xf32, #tpu.memory_space<vmem>>, vector<1x10x40xf32>
    %29 = vector.shape_cast %28 : vector<1x10x40xf32> to vector<10x40xf32>
    %cst_35 = arith.constant dense<0.000000e+00> : vector<2x40xf32>
    %30 = tpu.matmul %27, %29, %cst_35 {dimension_numbers = #tpu.dot_dimension_numbers<[1], [0], [0], [1], [0, 0, 1, 1], [], []>} : vector<2x10xf32>, vector<10x40xf32>, vector<2x40xf32> -> vector<2x40xf32>
    %c5 = arith.constant 5 : index
    %c0_36 = arith.constant 0 : index
    %c0_37 = arith.constant 0 : index
    %31 = vector.load %arg1[%c5, %c0_36, %c0_37] : memref<10x2x10xf32, #tpu.memory_space<vmem>>, vector<1x2x10xf32>
    %32 = vector.shape_cast %31 : vector<1x2x10xf32> to vector<2x10xf32>
    %c5_38 = arith.constant 5 : index
    %c0_39 = arith.constant 0 : index
    %c0_40 = arith.constant 0 : index
    %33 = vector.load %arg6[%c5_38, %c0_39, %c0_40] : memref<10x10x40xf32, #tpu.memory_space<vmem>>, vector<1x10x40xf32>
    %34 = vector.shape_cast %33 : vector<1x10x40xf32> to vector<10x40xf32>
    %cst_41 = arith.constant dense<0.000000e+00> : vector<2x40xf32>
    %35 = tpu.matmul %32, %34, %cst_41 {dimension_numbers = #tpu.dot_dimension_numbers<[1], [0], [0], [1], [0, 0, 1, 1], [], []>} : vector<2x10xf32>, vector<10x40xf32>, vector<2x40xf32> -> vector<2x40xf32>
    %c6 = arith.constant 6 : index
    %c0_42 = arith.constant 0 : index
    %c0_43 = arith.constant 0 : index
    %36 = vector.load %arg1[%c6, %c0_42, %c0_43] : memref<10x2x10xf32, #tpu.memory_space<vmem>>, vector<1x2x10xf32>
    %37 = vector.shape_cast %36 : vector<1x2x10xf32> to vector<2x10xf32>
    %c6_44 = arith.constant 6 : index
    %c0_45 = arith.constant 0 : index
    %c0_46 = arith.constant 0 : index
    %38 = vector.load %arg6[%c6_44, %c0_45, %c0_46] : memref<10x10x40xf32, #tpu.memory_space<vmem>>, vector<1x10x40xf32>
    %39 = vector.shape_cast %38 : vector<1x10x40xf32> to vector<10x40xf32>
    %cst_47 = arith.constant dense<0.000000e+00> : vector<2x40xf32>
    %40 = tpu.matmul %37, %39, %cst_47 {dimension_numbers = #tpu.dot_dimension_numbers<[1], [0], [0], [1], [0, 0, 1, 1], [], []>} : vector<2x10xf32>, vector<10x40xf32>, vector<2x40xf32> -> vector<2x40xf32>
    %c7 = arith.constant 7 : index
    %c0_48 = arith.constant 0 : index
    %c0_49 = arith.constant 0 : index
    %41 = vector.load %arg1[%c7, %c0_48, %c0_49] : memref<10x2x10xf32, #tpu.memory_space<vmem>>, vector<1x2x10xf32>
    %42 = vector.shape_cast %41 : vector<1x2x10xf32> to vector<2x10xf32>
    %c7_50 = arith.constant 7 : index
    %c0_51 = arith.constant 0 : index
    %c0_52 = arith.constant 0 : index
    %43 = vector.load %arg6[%c7_50, %c0_51, %c0_52] : memref<10x10x40xf32, #tpu.memory_space<vmem>>, vector<1x10x40xf32>
    %44 = vector.shape_cast %43 : vector<1x10x40xf32> to vector<10x40xf32>
    %cst_53 = arith.constant dense<0.000000e+00> : vector<2x40xf32>
    %45 = tpu.matmul %42, %44, %cst_53 {dimension_numbers = #tpu.dot_dimension_numbers<[1], [0], [0], [1], [0, 0, 1, 1], [], []>} : vector<2x10xf32>, vector<10x40xf32>, vector<2x40xf32> -> vector<2x40xf32>
    %c8 = arith.constant 8 : index
    %c0_54 = arith.constant 0 : index
    %c0_55 = arith.constant 0 : index
    %46 = vector.load %arg1[%c8, %c0_54, %c0_55] : memref<10x2x10xf32, #tpu.memory_space<vmem>>, vector<1x2x10xf32>
    %47 = vector.shape_cast %46 : vector<1x2x10xf32> to vector<2x10xf32>
    %c8_56 = arith.constant 8 : index
    %c0_57 = arith.constant 0 : index
    %c0_58 = arith.constant 0 : index
    %48 = vector.load %arg6[%c8_56, %c0_57, %c0_58] : memref<10x10x40xf32, #tpu.memory_space<vmem>>, vector<1x10x40xf32>
    %49 = vector.shape_cast %48 : vector<1x10x40xf32> to vector<10x40xf32>
    %cst_59 = arith.constant dense<0.000000e+00> : vector<2x40xf32>
    %50 = tpu.matmul %47, %49, %cst_59 {dimension_numbers = #tpu.dot_dimension_numbers<[1], [0], [0], [1], [0, 0, 1, 1], [], []>} : vector<2x10xf32>, vector<10x40xf32>, vector<2x40xf32> -> vector<2x40xf32>
    %c9 = arith.constant 9 : index
    %c0_60 = arith.constant 0 : index
    %c0_61 = arith.constant 0 : index
    %51 = vector.load %arg1[%c9, %c0_60, %c0_61] : memref<10x2x10xf32, #tpu.memory_space<vmem>>, vector<1x2x10xf32>
    %52 = vector.shape_cast %51 : vector<1x2x10xf32> to vector<2x10xf32>
    %c9_62 = arith.constant 9 : index
    %c0_63 = arith.constant 0 : index
    %c0_64 = arith.constant 0 : index
    %53 = vector.load %arg6[%c9_62, %c0_63, %c0_64] : memref<10x10x40xf32, #tpu.memory_space<vmem>>, vector<1x10x40xf32>
    %54 = vector.shape_cast %53 : vector<1x10x40xf32> to vector<10x40xf32>
    %cst_65 = arith.constant dense<0.000000e+00> : vector<2x40xf32>
    %55 = tpu.matmul %52, %54, %cst_65 {dimension_numbers = #tpu.dot_dimension_numbers<[1], [0], [0], [1], [0, 0, 1, 1], [], []>} : vector<2x10xf32>, vector<10x40xf32>, vector<2x40xf32> -> vector<2x40xf32>
    %c0_66 = arith.constant 0 : index
    %c0_67 = arith.constant 0 : index
    %c0_68 = arith.constant 0 : index
    %56 = vector.load %arg5[%c0_66, %c0_67, %c0_68] : memref<10x10x40xf32, #tpu.memory_space<vmem>>, vector<1x10x40xf32>
    %57 = vector.shape_cast %56 : vector<1x10x40xf32> to vector<10x40xf32>
    %cst_69 = arith.constant dense<0.000000e+00> : vector<2x40xf32>
    %58 = tpu.matmul %5, %57, %cst_69 {dimension_numbers = #tpu.dot_dimension_numbers<[1], [0], [0], [1], [0, 0, 1, 1], [], []>} : vector<2x10xf32>, vector<10x40xf32>, vector<2x40xf32> -> vector<2x40xf32>
    %59 = arith.addf %58, %10 : vector<2x40xf32>
    %c0_70 = arith.constant 0 : index
    %c0_71 = arith.constant 0 : index
    %c0_72 = arith.constant 0 : index
    %60 = vector.load %arg7[%c0_70, %c0_71, %c0_72] : memref<10x1x40xf32, #tpu.memory_space<vmem>>, vector<1x1x40xf32>
    %61 = vector.shape_cast %60 : vector<1x1x40xf32> to vector<1x40xf32>
    %62 = vector.broadcast %61 : vector<1x40xf32> to vector<2x40xf32>
    %63 = arith.addf %59, %62 : vector<2x40xf32>
    %64 = arith.negf %63 : vector<2x40xf32>
    %65 = math.exp %64 : vector<2x40xf32>
    %cst_73 = arith.constant 1.000000e+00 : f32
    %66 = vector.broadcast %cst_73 : f32 to vector<2x40xf32>
    %67 = arith.addf %66, %65 : vector<2x40xf32>
    %68 = arith.divf %66, %67 : vector<2x40xf32>
    %69 = math.tanh %63 : vector<2x40xf32>
    %70 = vector.extract_strided_slice %68 {offsets = [0, 0], sizes = [2, 10], strides = [1, 1]} : vector<2x40xf32> to vector<2x10xf32>
    %71 = vector.extract_strided_slice %68 {offsets = [0, 10], sizes = [2, 10], strides = [1, 1]} : vector<2x40xf32> to vector<2x10xf32>
    %72 = vector.extract_strided_slice %69 {offsets = [0, 20], sizes = [2, 10], strides = [1, 1]} : vector<2x40xf32> to vector<2x10xf32>
    %73 = vector.extract_strided_slice %68 {offsets = [0, 30], sizes = [2, 10], strides = [1, 1]} : vector<2x40xf32> to vector<2x10xf32>
    %c0_74 = arith.constant 0 : index
    %c0_75 = arith.constant 0 : index
    %c0_76 = arith.constant 0 : index
    %74 = vector.load %arg2[%c0_74, %c0_75, %c0_76] : memref<10x2x10xf32, #tpu.memory_space<vmem>>, vector<1x2x10xf32>
    %75 = vector.shape_cast %74 : vector<1x2x10xf32> to vector<2x10xf32>
    %76 = arith.mulf %71, %75 : vector<2x10xf32>
    %77 = arith.mulf %70, %72 : vector<2x10xf32>
    %78 = arith.addf %76, %77 : vector<2x10xf32>
    %79 = math.tanh %78 : vector<2x10xf32>
    %80 = arith.mulf %73, %79 : vector<2x10xf32>
    %c1_77 = arith.constant 1 : index
    %c0_78 = arith.constant 0 : index
    %c0_79 = arith.constant 0 : index
    %81 = vector.load %arg5[%c1_77, %c0_78, %c0_79] : memref<10x10x40xf32, #tpu.memory_space<vmem>>, vector<1x10x40xf32>
    %82 = vector.shape_cast %81 : vector<1x10x40xf32> to vector<10x40xf32>
    %cst_80 = arith.constant dense<0.000000e+00> : vector<2x40xf32>
    %83 = tpu.matmul %80, %82, %cst_80 {dimension_numbers = #tpu.dot_dimension_numbers<[1], [0], [0], [1], [0, 0, 1, 1], [], []>} : vector<2x10xf32>, vector<10x40xf32>, vector<2x40xf32> -> vector<2x40xf32>
    %84 = arith.addf %83, %15 : vector<2x40xf32>
    %c1_81 = arith.constant 1 : index
    %c0_82 = arith.constant 0 : index
    %c0_83 = arith.constant 0 : index
    %85 = vector.load %arg7[%c1_81, %c0_82, %c0_83] : memref<10x1x40xf32, #tpu.memory_space<vmem>>, vector<1x1x40xf32>
    %86 = vector.shape_cast %85 : vector<1x1x40xf32> to vector<1x40xf32>
    %87 = vector.broadcast %86 : vector<1x40xf32> to vector<2x40xf32>
    %88 = arith.addf %84, %87 : vector<2x40xf32>
    %89 = arith.negf %88 : vector<2x40xf32>
    %90 = math.exp %89 : vector<2x40xf32>
    %cst_84 = arith.constant 1.000000e+00 : f32
    %91 = vector.broadcast %cst_84 : f32 to vector<2x40xf32>
    %92 = arith.addf %91, %90 : vector<2x40xf32>
    %93 = arith.divf %91, %92 : vector<2x40xf32>
    %94 = math.tanh %88 : vector<2x40xf32>
    %95 = vector.extract_strided_slice %93 {offsets = [0, 0], sizes = [2, 10], strides = [1, 1]} : vector<2x40xf32> to vector<2x10xf32>
    %96 = vector.extract_strided_slice %93 {offsets = [0, 10], sizes = [2, 10], strides = [1, 1]} : vector<2x40xf32> to vector<2x10xf32>
    %97 = vector.extract_strided_slice %94 {offsets = [0, 20], sizes = [2, 10], strides = [1, 1]} : vector<2x40xf32> to vector<2x10xf32>
    %98 = vector.extract_strided_slice %93 {offsets = [0, 30], sizes = [2, 10], strides = [1, 1]} : vector<2x40xf32> to vector<2x10xf32>
    %c1_85 = arith.constant 1 : index
    %c0_86 = arith.constant 0 : index
    %c0_87 = arith.constant 0 : index
    %99 = vector.load %arg2[%c1_85, %c0_86, %c0_87] : memref<10x2x10xf32, #tpu.memory_space<vmem>>, vector<1x2x10xf32>
    %100 = vector.shape_cast %99 : vector<1x2x10xf32> to vector<2x10xf32>
    %101 = arith.mulf %96, %100 : vector<2x10xf32>
    %102 = arith.mulf %95, %97 : vector<2x10xf32>
    %103 = arith.addf %101, %102 : vector<2x10xf32>
    %104 = math.tanh %103 : vector<2x10xf32>
    %105 = arith.mulf %98, %104 : vector<2x10xf32>
    %c2_88 = arith.constant 2 : index
    %c0_89 = arith.constant 0 : index
    %c0_90 = arith.constant 0 : index
    %106 = vector.load %arg5[%c2_88, %c0_89, %c0_90] : memref<10x10x40xf32, #tpu.memory_space<vmem>>, vector<1x10x40xf32>
    %107 = vector.shape_cast %106 : vector<1x10x40xf32> to vector<10x40xf32>
    %cst_91 = arith.constant dense<0.000000e+00> : vector<2x40xf32>
    %108 = tpu.matmul %105, %107, %cst_91 {dimension_numbers = #tpu.dot_dimension_numbers<[1], [0], [0], [1], [0, 0, 1, 1], [], []>} : vector<2x10xf32>, vector<10x40xf32>, vector<2x40xf32> -> vector<2x40xf32>
    %109 = arith.addf %108, %20 : vector<2x40xf32>
    %c2_92 = arith.constant 2 : index
    %c0_93 = arith.constant 0 : index
    %c0_94 = arith.constant 0 : index
    %110 = vector.load %arg7[%c2_92, %c0_93, %c0_94] : memref<10x1x40xf32, #tpu.memory_space<vmem>>, vector<1x1x40xf32>
    %111 = vector.shape_cast %110 : vector<1x1x40xf32> to vector<1x40xf32>
    %112 = vector.broadcast %111 : vector<1x40xf32> to vector<2x40xf32>
    %113 = arith.addf %109, %112 : vector<2x40xf32>
    %114 = arith.negf %113 : vector<2x40xf32>
    %115 = math.exp %114 : vector<2x40xf32>
    %cst_95 = arith.constant 1.000000e+00 : f32
    %116 = vector.broadcast %cst_95 : f32 to vector<2x40xf32>
    %117 = arith.addf %116, %115 : vector<2x40xf32>
    %118 = arith.divf %116, %117 : vector<2x40xf32>
    %119 = math.tanh %113 : vector<2x40xf32>
    %120 = vector.extract_strided_slice %118 {offsets = [0, 0], sizes = [2, 10], strides = [1, 1]} : vector<2x40xf32> to vector<2x10xf32>
    %121 = vector.extract_strided_slice %118 {offsets = [0, 10], sizes = [2, 10], strides = [1, 1]} : vector<2x40xf32> to vector<2x10xf32>
    %122 = vector.extract_strided_slice %119 {offsets = [0, 20], sizes = [2, 10], strides = [1, 1]} : vector<2x40xf32> to vector<2x10xf32>
    %123 = vector.extract_strided_slice %118 {offsets = [0, 30], sizes = [2, 10], strides = [1, 1]} : vector<2x40xf32> to vector<2x10xf32>
    %c2_96 = arith.constant 2 : index
    %c0_97 = arith.constant 0 : index
    %c0_98 = arith.constant 0 : index
    %124 = vector.load %arg2[%c2_96, %c0_97, %c0_98] : memref<10x2x10xf32, #tpu.memory_space<vmem>>, vector<1x2x10xf32>
    %125 = vector.shape_cast %124 : vector<1x2x10xf32> to vector<2x10xf32>
    %126 = arith.mulf %121, %125 : vector<2x10xf32>
    %127 = arith.mulf %120, %122 : vector<2x10xf32>
    %128 = arith.addf %126, %127 : vector<2x10xf32>
    %129 = math.tanh %128 : vector<2x10xf32>
    %130 = arith.mulf %123, %129 : vector<2x10xf32>
    %c3_99 = arith.constant 3 : index
    %c0_100 = arith.constant 0 : index
    %c0_101 = arith.constant 0 : index
    %131 = vector.load %arg5[%c3_99, %c0_100, %c0_101] : memref<10x10x40xf32, #tpu.memory_space<vmem>>, vector<1x10x40xf32>
    %132 = vector.shape_cast %131 : vector<1x10x40xf32> to vector<10x40xf32>
    %cst_102 = arith.constant dense<0.000000e+00> : vector<2x40xf32>
    %133 = tpu.matmul %130, %132, %cst_102 {dimension_numbers = #tpu.dot_dimension_numbers<[1], [0], [0], [1], [0, 0, 1, 1], [], []>} : vector<2x10xf32>, vector<10x40xf32>, vector<2x40xf32> -> vector<2x40xf32>
    %134 = arith.addf %133, %25 : vector<2x40xf32>
    %c3_103 = arith.constant 3 : index
    %c0_104 = arith.constant 0 : index
    %c0_105 = arith.constant 0 : index
    %135 = vector.load %arg7[%c3_103, %c0_104, %c0_105] : memref<10x1x40xf32, #tpu.memory_space<vmem>>, vector<1x1x40xf32>
    %136 = vector.shape_cast %135 : vector<1x1x40xf32> to vector<1x40xf32>
    %137 = vector.broadcast %136 : vector<1x40xf32> to vector<2x40xf32>
    %138 = arith.addf %134, %137 : vector<2x40xf32>
    %139 = arith.negf %138 : vector<2x40xf32>
    %140 = math.exp %139 : vector<2x40xf32>
    %cst_106 = arith.constant 1.000000e+00 : f32
    %141 = vector.broadcast %cst_106 : f32 to vector<2x40xf32>
    %142 = arith.addf %141, %140 : vector<2x40xf32>
    %143 = arith.divf %141, %142 : vector<2x40xf32>
    %144 = math.tanh %138 : vector<2x40xf32>
    %145 = vector.extract_strided_slice %143 {offsets = [0, 0], sizes = [2, 10], strides = [1, 1]} : vector<2x40xf32> to vector<2x10xf32>
    %146 = vector.extract_strided_slice %143 {offsets = [0, 10], sizes = [2, 10], strides = [1, 1]} : vector<2x40xf32> to vector<2x10xf32>
    %147 = vector.extract_strided_slice %144 {offsets = [0, 20], sizes = [2, 10], strides = [1, 1]} : vector<2x40xf32> to vector<2x10xf32>
    %148 = vector.extract_strided_slice %143 {offsets = [0, 30], sizes = [2, 10], strides = [1, 1]} : vector<2x40xf32> to vector<2x10xf32>
    %c3_107 = arith.constant 3 : index
    %c0_108 = arith.constant 0 : index
    %c0_109 = arith.constant 0 : index
    %149 = vector.load %arg2[%c3_107, %c0_108, %c0_109] : memref<10x2x10xf32, #tpu.memory_space<vmem>>, vector<1x2x10xf32>
    %150 = vector.shape_cast %149 : vector<1x2x10xf32> to vector<2x10xf32>
    %151 = arith.mulf %146, %150 : vector<2x10xf32>
    %152 = arith.mulf %145, %147 : vector<2x10xf32>
    %153 = arith.addf %151, %152 : vector<2x10xf32>
    %154 = math.tanh %153 : vector<2x10xf32>
    %155 = arith.mulf %148, %154 : vector<2x10xf32>
    %c4_110 = arith.constant 4 : index
    %c0_111 = arith.constant 0 : index
    %c0_112 = arith.constant 0 : index
    %156 = vector.load %arg5[%c4_110, %c0_111, %c0_112] : memref<10x10x40xf32, #tpu.memory_space<vmem>>, vector<1x10x40xf32>
    %157 = vector.shape_cast %156 : vector<1x10x40xf32> to vector<10x40xf32>
    %cst_113 = arith.constant dense<0.000000e+00> : vector<2x40xf32>
    %158 = tpu.matmul %155, %157, %cst_113 {dimension_numbers = #tpu.dot_dimension_numbers<[1], [0], [0], [1], [0, 0, 1, 1], [], []>} : vector<2x10xf32>, vector<10x40xf32>, vector<2x40xf32> -> vector<2x40xf32>
    %159 = arith.addf %158, %30 : vector<2x40xf32>
    %c4_114 = arith.constant 4 : index
    %c0_115 = arith.constant 0 : index
    %c0_116 = arith.constant 0 : index
    %160 = vector.load %arg7[%c4_114, %c0_115, %c0_116] : memref<10x1x40xf32, #tpu.memory_space<vmem>>, vector<1x1x40xf32>
    %161 = vector.shape_cast %160 : vector<1x1x40xf32> to vector<1x40xf32>
    %162 = vector.broadcast %161 : vector<1x40xf32> to vector<2x40xf32>
    %163 = arith.addf %159, %162 : vector<2x40xf32>
    %164 = arith.negf %163 : vector<2x40xf32>
    %165 = math.exp %164 : vector<2x40xf32>
    %cst_117 = arith.constant 1.000000e+00 : f32
    %166 = vector.broadcast %cst_117 : f32 to vector<2x40xf32>
    %167 = arith.addf %166, %165 : vector<2x40xf32>
    %168 = arith.divf %166, %167 : vector<2x40xf32>
    %169 = math.tanh %163 : vector<2x40xf32>
    %170 = vector.extract_strided_slice %168 {offsets = [0, 0], sizes = [2, 10], strides = [1, 1]} : vector<2x40xf32> to vector<2x10xf32>
    %171 = vector.extract_strided_slice %168 {offsets = [0, 10], sizes = [2, 10], strides = [1, 1]} : vector<2x40xf32> to vector<2x10xf32>
    %172 = vector.extract_strided_slice %169 {offsets = [0, 20], sizes = [2, 10], strides = [1, 1]} : vector<2x40xf32> to vector<2x10xf32>
    %173 = vector.extract_strided_slice %168 {offsets = [0, 30], sizes = [2, 10], strides = [1, 1]} : vector<2x40xf32> to vector<2x10xf32>
    %c4_118 = arith.constant 4 : index
    %c0_119 = arith.constant 0 : index
    %c0_120 = arith.constant 0 : index
    %174 = vector.load %arg2[%c4_118, %c0_119, %c0_120] : memref<10x2x10xf32, #tpu.memory_space<vmem>>, vector<1x2x10xf32>
    %175 = vector.shape_cast %174 : vector<1x2x10xf32> to vector<2x10xf32>
    %176 = arith.mulf %171, %175 : vector<2x10xf32>
    %177 = arith.mulf %170, %172 : vector<2x10xf32>
    %178 = arith.addf %176, %177 : vector<2x10xf32>
    %179 = math.tanh %178 : vector<2x10xf32>
    %180 = arith.mulf %173, %179 : vector<2x10xf32>
    %c5_121 = arith.constant 5 : index
    %c0_122 = arith.constant 0 : index
    %c0_123 = arith.constant 0 : index
    %181 = vector.load %arg5[%c5_121, %c0_122, %c0_123] : memref<10x10x40xf32, #tpu.memory_space<vmem>>, vector<1x10x40xf32>
    %182 = vector.shape_cast %181 : vector<1x10x40xf32> to vector<10x40xf32>
    %cst_124 = arith.constant dense<0.000000e+00> : vector<2x40xf32>
    %183 = tpu.matmul %180, %182, %cst_124 {dimension_numbers = #tpu.dot_dimension_numbers<[1], [0], [0], [1], [0, 0, 1, 1], [], []>} : vector<2x10xf32>, vector<10x40xf32>, vector<2x40xf32> -> vector<2x40xf32>
    %184 = arith.addf %183, %35 : vector<2x40xf32>
    %c5_125 = arith.constant 5 : index
    %c0_126 = arith.constant 0 : index
    %c0_127 = arith.constant 0 : index
    %185 = vector.load %arg7[%c5_125, %c0_126, %c0_127] : memref<10x1x40xf32, #tpu.memory_space<vmem>>, vector<1x1x40xf32>
    %186 = vector.shape_cast %185 : vector<1x1x40xf32> to vector<1x40xf32>
    %187 = vector.broadcast %186 : vector<1x40xf32> to vector<2x40xf32>
    %188 = arith.addf %184, %187 : vector<2x40xf32>
    %189 = arith.negf %188 : vector<2x40xf32>
    %190 = math.exp %189 : vector<2x40xf32>
    %cst_128 = arith.constant 1.000000e+00 : f32
    %191 = vector.broadcast %cst_128 : f32 to vector<2x40xf32>
    %192 = arith.addf %191, %190 : vector<2x40xf32>
    %193 = arith.divf %191, %192 : vector<2x40xf32>
    %194 = math.tanh %188 : vector<2x40xf32>
    %195 = vector.extract_strided_slice %193 {offsets = [0, 0], sizes = [2, 10], strides = [1, 1]} : vector<2x40xf32> to vector<2x10xf32>
    %196 = vector.extract_strided_slice %193 {offsets = [0, 10], sizes = [2, 10], strides = [1, 1]} : vector<2x40xf32> to vector<2x10xf32>
    %197 = vector.extract_strided_slice %194 {offsets = [0, 20], sizes = [2, 10], strides = [1, 1]} : vector<2x40xf32> to vector<2x10xf32>
    %198 = vector.extract_strided_slice %193 {offsets = [0, 30], sizes = [2, 10], strides = [1, 1]} : vector<2x40xf32> to vector<2x10xf32>
    %c5_129 = arith.constant 5 : index
    %c0_130 = arith.constant 0 : index
    %c0_131 = arith.constant 0 : index
    %199 = vector.load %arg2[%c5_129, %c0_130, %c0_131] : memref<10x2x10xf32, #tpu.memory_space<vmem>>, vector<1x2x10xf32>
    %200 = vector.shape_cast %199 : vector<1x2x10xf32> to vector<2x10xf32>
    %201 = arith.mulf %196, %200 : vector<2x10xf32>
    %202 = arith.mulf %195, %197 : vector<2x10xf32>
    %203 = arith.addf %201, %202 : vector<2x10xf32>
    %204 = math.tanh %203 : vector<2x10xf32>
    %205 = arith.mulf %198, %204 : vector<2x10xf32>
    %c6_132 = arith.constant 6 : index
    %c0_133 = arith.constant 0 : index
    %c0_134 = arith.constant 0 : index
    %206 = vector.load %arg5[%c6_132, %c0_133, %c0_134] : memref<10x10x40xf32, #tpu.memory_space<vmem>>, vector<1x10x40xf32>
    %207 = vector.shape_cast %206 : vector<1x10x40xf32> to vector<10x40xf32>
    %cst_135 = arith.constant dense<0.000000e+00> : vector<2x40xf32>
    %208 = tpu.matmul %205, %207, %cst_135 {dimension_numbers = #tpu.dot_dimension_numbers<[1], [0], [0], [1], [0, 0, 1, 1], [], []>} : vector<2x10xf32>, vector<10x40xf32>, vector<2x40xf32> -> vector<2x40xf32>
    %209 = arith.addf %208, %40 : vector<2x40xf32>
    %c6_136 = arith.constant 6 : index
    %c0_137 = arith.constant 0 : index
    %c0_138 = arith.constant 0 : index
    %210 = vector.load %arg7[%c6_136, %c0_137, %c0_138] : memref<10x1x40xf32, #tpu.memory_space<vmem>>, vector<1x1x40xf32>
    %211 = vector.shape_cast %210 : vector<1x1x40xf32> to vector<1x40xf32>
    %212 = vector.broadcast %211 : vector<1x40xf32> to vector<2x40xf32>
    %213 = arith.addf %209, %212 : vector<2x40xf32>
    %214 = arith.negf %213 : vector<2x40xf32>
    %215 = math.exp %214 : vector<2x40xf32>
    %cst_139 = arith.constant 1.000000e+00 : f32
    %216 = vector.broadcast %cst_139 : f32 to vector<2x40xf32>
    %217 = arith.addf %216, %215 : vector<2x40xf32>
    %218 = arith.divf %216, %217 : vector<2x40xf32>
    %219 = math.tanh %213 : vector<2x40xf32>
    %220 = vector.extract_strided_slice %218 {offsets = [0, 0], sizes = [2, 10], strides = [1, 1]} : vector<2x40xf32> to vector<2x10xf32>
    %221 = vector.extract_strided_slice %218 {offsets = [0, 10], sizes = [2, 10], strides = [1, 1]} : vector<2x40xf32> to vector<2x10xf32>
    %222 = vector.extract_strided_slice %219 {offsets = [0, 20], sizes = [2, 10], strides = [1, 1]} : vector<2x40xf32> to vector<2x10xf32>
    %223 = vector.extract_strided_slice %218 {offsets = [0, 30], sizes = [2, 10], strides = [1, 1]} : vector<2x40xf32> to vector<2x10xf32>
    %c6_140 = arith.constant 6 : index
    %c0_141 = arith.constant 0 : index
    %c0_142 = arith.constant 0 : index
    %224 = vector.load %arg2[%c6_140, %c0_141, %c0_142] : memref<10x2x10xf32, #tpu.memory_space<vmem>>, vector<1x2x10xf32>
    %225 = vector.shape_cast %224 : vector<1x2x10xf32> to vector<2x10xf32>
    %226 = arith.mulf %221, %225 : vector<2x10xf32>
    %227 = arith.mulf %220, %222 : vector<2x10xf32>
    %228 = arith.addf %226, %227 : vector<2x10xf32>
    %229 = math.tanh %228 : vector<2x10xf32>
    %230 = arith.mulf %223, %229 : vector<2x10xf32>
    %c7_143 = arith.constant 7 : index
    %c0_144 = arith.constant 0 : index
    %c0_145 = arith.constant 0 : index
    %231 = vector.load %arg5[%c7_143, %c0_144, %c0_145] : memref<10x10x40xf32, #tpu.memory_space<vmem>>, vector<1x10x40xf32>
    %232 = vector.shape_cast %231 : vector<1x10x40xf32> to vector<10x40xf32>
    %cst_146 = arith.constant dense<0.000000e+00> : vector<2x40xf32>
    %233 = tpu.matmul %230, %232, %cst_146 {dimension_numbers = #tpu.dot_dimension_numbers<[1], [0], [0], [1], [0, 0, 1, 1], [], []>} : vector<2x10xf32>, vector<10x40xf32>, vector<2x40xf32> -> vector<2x40xf32>
    %234 = arith.addf %233, %45 : vector<2x40xf32>
    %c7_147 = arith.constant 7 : index
    %c0_148 = arith.constant 0 : index
    %c0_149 = arith.constant 0 : index
    %235 = vector.load %arg7[%c7_147, %c0_148, %c0_149] : memref<10x1x40xf32, #tpu.memory_space<vmem>>, vector<1x1x40xf32>
    %236 = vector.shape_cast %235 : vector<1x1x40xf32> to vector<1x40xf32>
    %237 = vector.broadcast %236 : vector<1x40xf32> to vector<2x40xf32>
    %238 = arith.addf %234, %237 : vector<2x40xf32>
    %239 = arith.negf %238 : vector<2x40xf32>
    %240 = math.exp %239 : vector<2x40xf32>
    %cst_150 = arith.constant 1.000000e+00 : f32
    %241 = vector.broadcast %cst_150 : f32 to vector<2x40xf32>
    %242 = arith.addf %241, %240 : vector<2x40xf32>
    %243 = arith.divf %241, %242 : vector<2x40xf32>
    %244 = math.tanh %238 : vector<2x40xf32>
    %245 = vector.extract_strided_slice %243 {offsets = [0, 0], sizes = [2, 10], strides = [1, 1]} : vector<2x40xf32> to vector<2x10xf32>
    %246 = vector.extract_strided_slice %243 {offsets = [0, 10], sizes = [2, 10], strides = [1, 1]} : vector<2x40xf32> to vector<2x10xf32>
    %247 = vector.extract_strided_slice %244 {offsets = [0, 20], sizes = [2, 10], strides = [1, 1]} : vector<2x40xf32> to vector<2x10xf32>
    %248 = vector.extract_strided_slice %243 {offsets = [0, 30], sizes = [2, 10], strides = [1, 1]} : vector<2x40xf32> to vector<2x10xf32>
    %c7_151 = arith.constant 7 : index
    %c0_152 = arith.constant 0 : index
    %c0_153 = arith.constant 0 : index
    %249 = vector.load %arg2[%c7_151, %c0_152, %c0_153] : memref<10x2x10xf32, #tpu.memory_space<vmem>>, vector<1x2x10xf32>
    %250 = vector.shape_cast %249 : vector<1x2x10xf32> to vector<2x10xf32>
    %251 = arith.mulf %246, %250 : vector<2x10xf32>
    %252 = arith.mulf %245, %247 : vector<2x10xf32>
    %253 = arith.addf %251, %252 : vector<2x10xf32>
    %254 = math.tanh %253 : vector<2x10xf32>
    %255 = arith.mulf %248, %254 : vector<2x10xf32>
    %c8_154 = arith.constant 8 : index
    %c0_155 = arith.constant 0 : index
    %c0_156 = arith.constant 0 : index
    %256 = vector.load %arg5[%c8_154, %c0_155, %c0_156] : memref<10x10x40xf32, #tpu.memory_space<vmem>>, vector<1x10x40xf32>
    %257 = vector.shape_cast %256 : vector<1x10x40xf32> to vector<10x40xf32>
    %cst_157 = arith.constant dense<0.000000e+00> : vector<2x40xf32>
    %258 = tpu.matmul %255, %257, %cst_157 {dimension_numbers = #tpu.dot_dimension_numbers<[1], [0], [0], [1], [0, 0, 1, 1], [], []>} : vector<2x10xf32>, vector<10x40xf32>, vector<2x40xf32> -> vector<2x40xf32>
    %259 = arith.addf %258, %50 : vector<2x40xf32>
    %c8_158 = arith.constant 8 : index
    %c0_159 = arith.constant 0 : index
    %c0_160 = arith.constant 0 : index
    %260 = vector.load %arg7[%c8_158, %c0_159, %c0_160] : memref<10x1x40xf32, #tpu.memory_space<vmem>>, vector<1x1x40xf32>
    %261 = vector.shape_cast %260 : vector<1x1x40xf32> to vector<1x40xf32>
    %262 = vector.broadcast %261 : vector<1x40xf32> to vector<2x40xf32>
    %263 = arith.addf %259, %262 : vector<2x40xf32>
    %264 = arith.negf %263 : vector<2x40xf32>
    %265 = math.exp %264 : vector<2x40xf32>
    %cst_161 = arith.constant 1.000000e+00 : f32
    %266 = vector.broadcast %cst_161 : f32 to vector<2x40xf32>
    %267 = arith.addf %266, %265 : vector<2x40xf32>
    %268 = arith.divf %266, %267 : vector<2x40xf32>
    %269 = math.tanh %263 : vector<2x40xf32>
    %270 = vector.extract_strided_slice %268 {offsets = [0, 0], sizes = [2, 10], strides = [1, 1]} : vector<2x40xf32> to vector<2x10xf32>
    %271 = vector.extract_strided_slice %268 {offsets = [0, 10], sizes = [2, 10], strides = [1, 1]} : vector<2x40xf32> to vector<2x10xf32>
    %272 = vector.extract_strided_slice %269 {offsets = [0, 20], sizes = [2, 10], strides = [1, 1]} : vector<2x40xf32> to vector<2x10xf32>
    %273 = vector.extract_strided_slice %268 {offsets = [0, 30], sizes = [2, 10], strides = [1, 1]} : vector<2x40xf32> to vector<2x10xf32>
    %c8_162 = arith.constant 8 : index
    %c0_163 = arith.constant 0 : index
    %c0_164 = arith.constant 0 : index
    %274 = vector.load %arg2[%c8_162, %c0_163, %c0_164] : memref<10x2x10xf32, #tpu.memory_space<vmem>>, vector<1x2x10xf32>
    %275 = vector.shape_cast %274 : vector<1x2x10xf32> to vector<2x10xf32>
    %276 = arith.mulf %271, %275 : vector<2x10xf32>
    %277 = arith.mulf %270, %272 : vector<2x10xf32>
    %278 = arith.addf %276, %277 : vector<2x10xf32>
    %279 = math.tanh %278 : vector<2x10xf32>
    %280 = arith.mulf %273, %279 : vector<2x10xf32>
    %c9_165 = arith.constant 9 : index
    %c0_166 = arith.constant 0 : index
    %c0_167 = arith.constant 0 : index
    %281 = vector.load %arg5[%c9_165, %c0_166, %c0_167] : memref<10x10x40xf32, #tpu.memory_space<vmem>>, vector<1x10x40xf32>
    %282 = vector.shape_cast %281 : vector<1x10x40xf32> to vector<10x40xf32>
    %cst_168 = arith.constant dense<0.000000e+00> : vector<2x40xf32>
    %283 = tpu.matmul %280, %282, %cst_168 {dimension_numbers = #tpu.dot_dimension_numbers<[1], [0], [0], [1], [0, 0, 1, 1], [], []>} : vector<2x10xf32>, vector<10x40xf32>, vector<2x40xf32> -> vector<2x40xf32>
    %284 = arith.addf %283, %55 : vector<2x40xf32>
    %c9_169 = arith.constant 9 : index
    %c0_170 = arith.constant 0 : index
    %c0_171 = arith.constant 0 : index
    %285 = vector.load %arg7[%c9_169, %c0_170, %c0_171] : memref<10x1x40xf32, #tpu.memory_space<vmem>>, vector<1x1x40xf32>
    %286 = vector.shape_cast %285 : vector<1x1x40xf32> to vector<1x40xf32>
    %287 = vector.broadcast %286 : vector<1x40xf32> to vector<2x40xf32>
    %288 = arith.addf %284, %287 : vector<2x40xf32>
    %289 = arith.negf %288 : vector<2x40xf32>
    %290 = math.exp %289 : vector<2x40xf32>
    %cst_172 = arith.constant 1.000000e+00 : f32
    %291 = vector.broadcast %cst_172 : f32 to vector<2x40xf32>
    %292 = arith.addf %291, %290 : vector<2x40xf32>
    %293 = arith.divf %291, %292 : vector<2x40xf32>
    %294 = math.tanh %288 : vector<2x40xf32>
    %295 = vector.extract_strided_slice %293 {offsets = [0, 0], sizes = [2, 10], strides = [1, 1]} : vector<2x40xf32> to vector<2x10xf32>
    %296 = vector.extract_strided_slice %293 {offsets = [0, 10], sizes = [2, 10], strides = [1, 1]} : vector<2x40xf32> to vector<2x10xf32>
    %297 = vector.extract_strided_slice %294 {offsets = [0, 20], sizes = [2, 10], strides = [1, 1]} : vector<2x40xf32> to vector<2x10xf32>
    %298 = vector.extract_strided_slice %293 {offsets = [0, 30], sizes = [2, 10], strides = [1, 1]} : vector<2x40xf32> to vector<2x10xf32>
    %c9_173 = arith.constant 9 : index
    %c0_174 = arith.constant 0 : index
    %c0_175 = arith.constant 0 : index
    %299 = vector.load %arg2[%c9_173, %c0_174, %c0_175] : memref<10x2x10xf32, #tpu.memory_space<vmem>>, vector<1x2x10xf32>
    %300 = vector.shape_cast %299 : vector<1x2x10xf32> to vector<2x10xf32>
    %301 = arith.mulf %296, %300 : vector<2x10xf32>
    %302 = arith.mulf %295, %297 : vector<2x10xf32>
    %303 = arith.addf %301, %302 : vector<2x10xf32>
    %304 = math.tanh %303 : vector<2x10xf32>
    %305 = arith.mulf %298, %304 : vector<2x10xf32>
    %306 = vector.shape_cast %80 : vector<2x10xf32> to vector<1x2x10xf32>
    %307 = vector.shape_cast %105 : vector<2x10xf32> to vector<1x2x10xf32>
    %308 = vector.shape_cast %130 : vector<2x10xf32> to vector<1x2x10xf32>
    %309 = vector.shape_cast %155 : vector<2x10xf32> to vector<1x2x10xf32>
    %310 = vector.shape_cast %180 : vector<2x10xf32> to vector<1x2x10xf32>
    %311 = vector.shape_cast %205 : vector<2x10xf32> to vector<1x2x10xf32>
    %312 = vector.shape_cast %230 : vector<2x10xf32> to vector<1x2x10xf32>
    %313 = vector.shape_cast %255 : vector<2x10xf32> to vector<1x2x10xf32>
    %314 = vector.shape_cast %280 : vector<2x10xf32> to vector<1x2x10xf32>
    %315 = vector.shape_cast %305 : vector<2x10xf32> to vector<1x2x10xf32>
    %316 = tpu.concatenate %306, %307, %308, %309, %310, %311, %312, %313, %314, %315 in 0 : vector<1x2x10xf32>, vector<1x2x10xf32>, vector<1x2x10xf32>, vector<1x2x10xf32>, vector<1x2x10xf32>, vector<1x2x10xf32>, vector<1x2x10xf32>, vector<1x2x10xf32>, vector<1x2x10xf32>, vector<1x2x10xf32> -> vector<10x2x10xf32>
    %c0_176 = arith.constant 0 : index
    %c0_177 = arith.constant 0 : index
    %c0_178 = arith.constant 0 : index
    %317 = vector.load %arg13[%c0_176, %c0_177, %c0_178] : memref<10x2x10xf32, #tpu.memory_space<vmem>>, vector<10x2x10xf32>
    tpu.vector_store %arg13[%c0_176, %c0_177, %c0_178], %316 {strides = array<i32>} : memref<10x2x10xf32, #tpu.memory_space<vmem>>, vector<10x2x10xf32>,
    %318 = vector.shape_cast %78 : vector<2x10xf32> to vector<1x2x10xf32>
    %319 = vector.shape_cast %103 : vector<2x10xf32> to vector<1x2x10xf32>
    %320 = vector.shape_cast %128 : vector<2x10xf32> to vector<1x2x10xf32>
    %321 = vector.shape_cast %153 : vector<2x10xf32> to vector<1x2x10xf32>
    %322 = vector.shape_cast %178 : vector<2x10xf32> to vector<1x2x10xf32>
    %323 = vector.shape_cast %203 : vector<2x10xf32> to vector<1x2x10xf32>
    %324 = vector.shape_cast %228 : vector<2x10xf32> to vector<1x2x10xf32>
    %325 = vector.shape_cast %253 : vector<2x10xf32> to vector<1x2x10xf32>
    %326 = vector.shape_cast %278 : vector<2x10xf32> to vector<1x2x10xf32>
    %327 = vector.shape_cast %303 : vector<2x10xf32> to vector<1x2x10xf32>
    %328 = tpu.concatenate %318, %319, %320, %321, %322, %323, %324, %325, %326, %327 in 0 : vector<1x2x10xf32>, vector<1x2x10xf32>, vector<1x2x10xf32>, vector<1x2x10xf32>, vector<1x2x10xf32>, vector<1x2x10xf32>, vector<1x2x10xf32>, vector<1x2x10xf32>, vector<1x2x10xf32>, vector<1x2x10xf32> -> vector<10x2x10xf32>
    %c0_179 = arith.constant 0 : index
    %c0_180 = arith.constant 0 : index
    %c0_181 = arith.constant 0 : index
    %329 = vector.load %arg14[%c0_179, %c0_180, %c0_181] : memref<10x2x10xf32, #tpu.memory_space<vmem>>, vector<10x2x10xf32>
    tpu.vector_store %arg14[%c0_179, %c0_180, %c0_181], %328 {strides = array<i32>} : memref<10x2x10xf32, #tpu.memory_space<vmem>>, vector<10x2x10xf32>,
    %c0_182 = arith.constant 0 : index
    %c0_183 = arith.constant 0 : index
    %330 = vector.load %arg8[%c0_182, %c0_183] : memref<10x8xf32, #tpu.memory_space<vmem>>, vector<10x8xf32>
    %cst_184 = arith.constant dense<0.000000e+00> : vector<2x8xf32>
    %331 = tpu.matmul %305, %330, %cst_184 {dimension_numbers = #tpu.dot_dimension_numbers<[1], [0], [0], [1], [0, 0, 1, 1], [], []>} : vector<2x10xf32>, vector<10x8xf32>, vector<2x8xf32> -> vector<2x8xf32>
    %c0_185 = arith.constant 0 : index
    %c0_186 = arith.constant 0 : index
    %332 = vector.load %arg9[%c0_185, %c0_186] : memref<1x8xf32, #tpu.memory_space<vmem>>, vector<1x8xf32>
    %333 = vector.broadcast %332 : vector<1x8xf32> to vector<2x8xf32>
    %334 = arith.addf %331, %333 : vector<2x8xf32>
    %cst_187 = arith.constant 0.000000e+00 : f32
    %335 = vector.broadcast %cst_187 : f32 to vector<2x8xf32>
    %336 = arith.maximumf %334, %335 : vector<2x8xf32>
    %c0_188 = arith.constant 0 : index
    %c0_189 = arith.constant 0 : index
    %337 = vector.load %arg10[%c0_188, %c0_189] : memref<8x8xf32, #tpu.memory_space<vmem>>, vector<8x8xf32>
    %cst_190 = arith.constant dense<0.000000e+00> : vector<2x8xf32>
    %338 = tpu.matmul %336, %337, %cst_190 {dimension_numbers = #tpu.dot_dimension_numbers<[1], [0], [0], [1], [0, 0, 1, 1], [], []>} : vector<2x8xf32>, vector<8x8xf32>, vector<2x8xf32> -> vector<2x8xf32>
    %c0_191 = arith.constant 0 : index
    %c0_192 = arith.constant 0 : index
    %339 = vector.load %arg11[%c0_191, %c0_192] : memref<1x8xf32, #tpu.memory_space<vmem>>, vector<1x8xf32>
    %340 = vector.broadcast %339 : vector<1x8xf32> to vector<2x8xf32>
    %341 = arith.addf %338, %340 : vector<2x8xf32>
    %c0_193 = arith.constant 0 : index
    %c0_194 = arith.constant 0 : index
    %342 = vector.load %arg12[%c0_193, %c0_194] : memref<2x8xf32, #tpu.memory_space<vmem>>, vector<2x8xf32>
    tpu.vector_store %arg12[%c0_193, %c0_194], %341 {strides = array<i32>} : memref<2x8xf32, #tpu.memory_space<vmem>>, vector<2x8xf32>,
    return
  }
}

</mosaic_0001>

<bundles_post_ra>
// kernel: drqn_forward.1
= control target key start
LH: loop header
LB: loop body
LE: loop exit
PB: predicated region body
PF: predicated region fallthrough
CT: control target
= control target key end

     0   :  { %20 = vsyncpa [#allocation3], 0  ;;  %s3626_s0 = inlined_call_operand.hbm [shape: f32[2,16], index: 0, kind: input, shape index: {}]   ;;  %s3627_s1 = inlined_call_operand.vmem [shape: f32[10,2,10], index: 1, kind: input, shape index: {}]   ;;  %s3628_s2 = inlined_call_operand.hbm [shape: f32[10,2,10], index: 2, kind: input, shape index: {}]   ;;  %s3629_s3 = inlined_call_operand.vmem [shape: f32[16,10], index: 3, kind: input, shape index: {}]   ;;  %s3630_s4 = inlined_call_operand.vmem [shape: f32[1,10], index: 4, kind: input, shape index: {}]   ;;  %s3631_s5 = inlined_call_operand.hbm [shape: f32[10,10,40], index: 5, kind: input, shape index: {}]   ;;  %s3632_s6 = inlined_call_operand.hbm [shape: f32[10,10,40], index: 6, kind: input, shape index: {}]   ;;  %s3633_s7 = inlined_call_operand.hbm [shape: f32[10,1,40], index: 7, kind: input, shape index: {}]   ;;  %s3634_s8 = inlined_call_operand.vmem [shape: f32[10,8], index: 8, kind: input, shape index: {}]   ;;  %s3635_s9 = inlined_call_operand.hbm [shape: f32[1,8], index: 9, kind: input, shape index: {}]   ;;  %s3636_s10 = inlined_call_operand.hbm [shape: f32[8,8], index: 10, kind: input, shape index: {}]   ;;  %s3637_s11 = inlined_call_operand.hbm [shape: f32[1,8], index: 11, kind: input, shape index: {}]   ;;  %s3638_s12 = inlined_call_operand.hbm [shape: f32[2,8], index: 12, kind: output, shape index: {0}]   ;;  %s3639_s13 = inlined_call_operand.hbm [shape: f32[10,2,10], index: 13, kind: output, shape index: {1}]   ;;  %s3640_s14 = inlined_call_operand.hbm [shape: f32[10,2,10], index: 14, kind: output, shape index: {2}]  }
   0x1   :  { %21 = vsyncpa [#allocation6], 0 }
   0x2   :  { %22 = vsyncpa [#allocation9], 0 }
   0x3   :  { %23 = vsyncpa [#allocation12], 0 }
   0x4   :  { %24 = vsyncpa [#allocation15], 0 }
   0x5   :  { %25 = vsyncpa [#allocation4], 0 }
   0x6   :  { %26 = vsyncpa [#allocation18], 0  ;;  %s3170_s29 = smov [#allocation5]  }
   0x7   :  { %s44_s30 = sshll.u32 %s3170_s29, 4  ;;  %s45_s30 = int_to_ptr.vmem [resolvable:$true] %s44_s30 }
   0x8   :  { %s2944_s15 = scalar_lea.vmem %s45_s30, 320  ;;  %p2949_p1 = scmp.lt.s32.totalorder %s45_s30, %s45_s30 }
   0x9   :  { %p2945_p0 = scmp.ne.s32.totalorder %s45_s30, %s2944_s15  ;;  %p2950_p2 = scmp.lt.s32.totalorder %s2944_s15, %s2944_s15 }
   0xb   :  { %p2951_p3 = por %p2950_p2, %p2949_p1 }
   0xd   :  { %p2952_p4 = pnand %p2951_p3, %p2945_p0 }
   0xf   :  { %2955 = shalt.err (!%p2952_p4)
}
  0x10   :  { %s3171_s16 = smov 32   ;;  %s3172_s17 = smov 2  }
  0x11   :  { %50 = dma.hbm_to_vmem [thread:$0]  %s3628_s2, 320, %s45_s30, [#allocation6], %s3171_s16, %s3171_s16, %s3172_s17  }
  0x12   :  { %s3173_s20 = smov [#allocation8]   ;;  %s3174_s22 = smov [#allocation11]  }
  0x13   :  { %s72_s21 = sshll.u32 %s3173_s20, 4  ;;  %s99_s23 = sshll.u32 %s3174_s22, 4  ;;  %s73_s21 = int_to_ptr.vmem [resolvable:$true] %s72_s21  ;;  %s100_s23 = int_to_ptr.vmem [resolvable:$true] %s99_s23 }
  0x14   :  { %s2964_s24 = scalar_lea.vmem %s73_s21, 2560  ;;  %p2969_p6 = scmp.lt.s32.totalorder %s73_s21, %s73_s21 }
  0x15   :  { %p2965_p5 = scmp.ne.s32.totalorder %s73_s21, %s2964_s24  ;;  %p2970_p7 = scmp.lt.s32.totalorder %s2964_s24, %s2964_s24 }
  0x17   :  { %p2971_p8 = por %p2970_p7, %p2969_p6 }
  0x19   :  { %p2972_p9 = pnand %p2971_p8, %p2965_p5 }
  0x1b   :  { %2975 = shalt.err (!%p2972_p9)
}
  0x1c   :  { %s3175_s25 = smov 128   ;;  %s3176_s26 = smov 8  }
  0x1d   :  { %78 = dma.hbm_to_vmem [thread:$0]  %s3632_s6, 2560, %s73_s21, [#allocation9], %s3175_s25, %s3175_s25, %s3176_s26  }
  0x1e   :  { %s2984_s2 = scalar_lea.vmem %s100_s23, 16  ;;  %s2988_s29 = scalar_lea.vmem %s100_s23, 32 }
  0x1f   :  { %p2985_p10 = scmp.ne.s32.totalorder %s100_s23, %s2984_s2  ;;  %p2989_p11 = scmp.lt.s32.totalorder %s100_s23, %s100_s23 }
  0x20   :  { %p2990_p12 = scmp.lt.s32.totalorder %s2988_s29, %s2984_s2 }
  0x22   :  { %p2991_p13 = por %p2990_p12, %p2989_p11 }
  0x24   :  { %p2992_p0 = pnand %p2991_p13, %p2985_p10 }
  0x26   :  { %2995 = shalt.err (!%p2992_p0)
}
  0x27   :  { %102 = dma.hbm_to_vmem [thread:$0]  %s3635_s9, 16, %s100_s23, [#allocation12]  }
  0x28   :  { %s3177_s18 = smov [#allocation2]   ;;  %s3178_s20 = smov [#allocation7]  }
  0x29   :  { %s33_s19 = sshll.u32 %s3177_s18, 4  ;;  %s60_s22 = sshll.u32 %s3178_s20, 4  ;;  %s34_s19 = int_to_ptr.vmem [resolvable:$true] %s33_s19  ;;  %s61_s22 = int_to_ptr.vmem [resolvable:$true] %s60_s22 }
  0x2a   :  { %s3004_s24 = scalar_lea.vmem %s34_s19, 32  ;;  %p3009_p2 = scmp.lt.s32.totalorder %s34_s19, %s34_s19 }
  0x2b   :  { %p3005_p1 = scmp.ne.s32.totalorder %s34_s19, %s3004_s24  ;;  %p3010_p3 = scmp.lt.s32.totalorder %s3004_s24, %s3004_s24 }
  0x2d   :  { %p3011_p4 = por %p3010_p3, %p3009_p2 }
  0x2f   :  { %p3012_p5 = pnand %p3011_p4, %p3005_p1 }
  0x31   :  { %3015 = shalt.err (!%p3012_p5)
}
  0x32   :  { %36 = dma.hbm_to_vmem [thread:$0]  %s3626_s0, 32, %s34_s19, [#allocation3]  }
  0x33   :  { %s3024_s27 = scalar_lea.vmem %s61_s22, 2560  ;;  %p3029_p7 = scmp.lt.s32.totalorder %s61_s22, %s61_s22 }
  0x34   :  { %p3025_p6 = scmp.ne.s32.totalorder %s61_s22, %s3024_s27  ;;  %p3030_p8 = scmp.lt.s32.totalorder %s3024_s27, %s3024_s27 }
  0x36   :  { %p3031_p9 = por %p3030_p8, %p3029_p7 }
  0x38   :  { %p3032_p10 = pnand %p3031_p9, %p3025_p6 }
  0x3a   :  { %3035 = shalt.err (!%p3032_p10)
}
  0x3b   :  { %66 = dma.hbm_to_vmem [thread:$0]  %s3631_s5, 2560, %s61_s22, [#allocation6], %s3175_s25, %s3175_s25, %s3176_s26  }
  0x3c   :  { %s3179_s28 = smov [#allocation10]  }
  0x3d   :  { %s84_s2 = sshll.u32 %s3179_s28, 4  ;;  %s85_s2 = int_to_ptr.vmem [resolvable:$true] %s84_s2 }
  0x3e   :  { %s3044_s29 = scalar_lea.vmem %s85_s2, 160  ;;  %p3049_p12 = scmp.lt.s32.totalorder %s85_s2, %s85_s2 }
  0x3f   :  { %p3045_p11 = scmp.ne.s32.totalorder %s85_s2, %s3044_s29  ;;  %p3050_p13 = scmp.lt.s32.totalorder %s3044_s29, %s3044_s29 }
  0x41   :  { %p3051_p0 = por %p3050_p13, %p3049_p12 }
  0x43   :  { %p3052_p1 = pnand %p3051_p0, %p3045_p11 }
  0x45   :  { %3055 = shalt.err (!%p3052_p1)
}
  0x46   :  { %s3180_s0 = smov 16   ;;  %s3181_s30 = smov 1  }
  0x47   :  { %90 = dma.hbm_to_vmem [thread:$0]  %s3633_s7, 160, %s85_s2, [#allocation9], %s3180_s0, %s3180_s0, %s3181_s30  }
  0x48   :  { %s3182_s19 = smov [#allocation13]   ;;  %s3183_s24 = smov [#allocation14]  }
  0x49   :  { %s109_s20 = sshll.u32 %s3182_s19, 4  ;;  %s119_s5 = sshll.u32 %s3183_s24, 4  ;;  %s110_s20 = int_to_ptr.vmem [resolvable:$true] %s109_s20  ;;  %s120_s5 = int_to_ptr.vmem [resolvable:$true] %s119_s5 }
  0x4a   :  { %s3064_s25 = scalar_lea.vmem %s110_s20, 128  ;;  %p3069_p3 = scmp.lt.s32.totalorder %s110_s20, %s110_s20 }
  0x4b   :  { %p3065_p2 = scmp.ne.s32.totalorder %s110_s20, %s3064_s25  ;;  %p3070_p4 = scmp.lt.s32.totalorder %s3064_s25, %s3064_s25 }
  0x4d   :  { %p3071_p5 = por %p3070_p4, %p3069_p3 }
  0x4f   :  { %p3072_p6 = pnand %p3071_p5, %p3065_p2 }
  0x51   :  { %3075 = shalt.err (!%p3072_p6)
}
  0x52   :  { %112 = dma.hbm_to_vmem [thread:$0]  %s3636_s10, 128, %s110_s20, [#allocation12]  }
  0x53   :  { %s3084_s6 = scalar_lea.vmem %s120_s5, 16  ;;  %s3088_s7 = scalar_lea.vmem %s120_s5, 32 }
  0x54   :  { %p3085_p7 = scmp.ne.s32.totalorder %s120_s5, %s3084_s6  ;;  %p3089_p8 = scmp.lt.s32.totalorder %s120_s5, %s120_s5 }
  0x55   :  { %p3090_p9 = scmp.lt.s32.totalorder %s3088_s7, %s3084_s6 }
  0x57   :  { %p3091_p10 = por %p3090_p9, %p3089_p8 }
  0x59   :  { %p3092_p11 = pnand %p3091_p10, %p3085_p7 }
  0x5b   :  { %3095 = shalt.err (!%p3092_p11)
}
  0x5c   :  { %122 = dma.hbm_to_vmem [thread:$0]  %s3637_s11, 16, %s120_s5, [#allocation15]  }
  0x5d   :  { %3156 = dma.done.wait [#allocation3], 32  }
  0x5e   :  { %3157 = vsyncadd [#allocation3], 4294967264 }
  0x5f   :  { %3158 = dma.done.wait [#allocation6], 2880  }
  0x60   :  { %3159 = vsyncadd [#allocation6], 4294964416 }
  0x61   :  { %3160 = dma.done.wait [#allocation9], 2720  }
  0x62   :  { %3161 = vsyncadd [#allocation9], 4294964576 }
  0x63   :  { %3162 = dma.done.wait [#allocation12], 144  }
  0x64   :  { %3163 = vsyncadd [#allocation12], 4294967152 }
  0x65   :  { %3164 = dma.done.wait [#allocation15], 16  }
  0x66   :  { %3165 = vsyncadd [#allocation15], 4294967280  ;;  %v3184_v0 = vmov 0.0   ;;  %vm3185_vm0 = vmmov 0   ;;  %vm238_vm1 = vcmask 1041408   ;;  %v149_v1 = vld [vmem:[%s3629_s3 + $0x8] sm:$0xff] }
  0x67   :  { %2673 = vmatprep.subr.mxu0 %v3184_v0  ;;  %2677 = vmatprep.mubr.msk.f32.mxu0 %vm3185_vm0, %v3184_v0  ;;  %v148_v2 = vld [vmem:[%s3629_s3] sm:$0xff]  ;;  %vm157_vm2 = vcmask 130048   ;;  %v233_v4 = vld [vmem:[#allocation8 + $0x8] sm:$0x3]  ;;  %v232_v5 = vld [vmem:[#allocation8] sm:$0xff]  ;;  %vm234_vm3 = vcmask 80896  }
  0x68   :  { %2680 = vmatprep.subr.mxu1 %v3184_v0  ;;  %2684 = vmatprep.mubr.msk.f32.mxu1 %vm3185_vm0, %v3184_v0  ;;  %v147_v3 = vld [vmem:[#allocation2] sm:$0x3]  ;;  %v397_v7 = vld [vmem:[#allocation8 + $0x28] sm:$0x3]  ;;  %v396_v8 = vld [vmem:[#allocation8 + $0x20] sm:$0xff]  ;;  %s3187_s25 = smov 10  }
  0x69   :  { %2674 = vmatpush3.msra.mxu0 %v149_v1  ;;  %2681 = vmatpush3.msk.msra.mxu1 %vm238_vm1, %v233_v4  ;;  %v231_v6 = vld [vmem:[%s3627_s1] sm:$0x3]  ;;  %v2536_v9 = vld [vmem:[%s3627_s1 + $0x4] sm:$0x3]  ;;  %v559_v10 = vld [vmem:[#allocation8 + $0x48] sm:$0x3] }
  0x6a   :  { %2675 = vmatprep.subr.mxu0 %v3184_v0  ;;  %2682 = vmatprep.subr.mxu1 %v3184_v0  ;;  %v558_v11 = vld [vmem:[#allocation8 + $0x40] sm:$0xff]  ;;  %v2542_v12 = vld [vmem:[%s3627_s1 + $0x8] sm:$0x3]  ;;  %v721_v13 = vld [vmem:[#allocation8 + $0x68] sm:$0x3]  ;;  %s3188_s10 = smov 20  }
  0x6b   :  { %2676 = vmatpush3.msra.mxu0 %v148_v2  ;;  %2683 = vmatpush3.msra.mxu1 %v232_v5  ;;  %v720_v14 = vld [vmem:[#allocation8 + $0x60] sm:$0xff]  ;;  %v2548_v15 = vld [vmem:[%s3627_s1 + $0xc] sm:$0x3]  ;;  %v883_v16 = vld [vmem:[#allocation8 + $0x88] sm:$0x3]  ;;  %vm2249_vm4 = vcmask 74752  }
  0x6c   :  { %2678 = vmatmul.mubr.msk.f32.vlgmr.msra.gmra.mxu0 %vm157_vm2, %v147_v3  ;;  %2685 = vmatmul.mubr.msk.f32.vlgmr.msra.gmra.mxu1 %vm234_vm3, %v231_v6  ;;  %v882_v17 = vld [vmem:[#allocation8 + $0x80] sm:$0xff]  ;;  %v2554_v18 = vld [vmem:[%s3627_s1 + $0x10] sm:$0x3]  ;;  %v1042_v19 = vld [vmem:[#allocation7 + $0x8] sm:$0x3]  ;;  %s3190_s2 = smov 118  }
  0x6d   :  { %2694 = vmatprep.subr.mxu1 %v3184_v0  ;;  %2698 = vmatprep.mubr.msk.f32.mxu1 %vm3185_vm0, %v3184_v0  ;;  %v1041_v20 = vld [vmem:[#allocation7] sm:$0xff]  ;;  %v2529_v21 = vld [vmem:[%s3630_s4] ss:$0 sm:$0xff]  ;;  %s3186_s4 = smov 108   ;;  %v1134_v41 = vld [vmem:[#allocation5] sm:$0x3] }
  0x6e   :  { %2695 = vmatpush3.msk.msra.mxu1 %vm238_vm1, %v397_v7  ;;  %2687 = vmatprep.subr.mxu0 %v3184_v0  ;;  %v2562_v36 = vld [vmem:[#allocation10] ss:$0 sm:$0xff]  ;;  %v316_v52 = vld [vmem:[#allocation8 + $0x18] sm:$0x3]  ;;  %v315_v53 = vld [vmem:[#allocation8 + $0x10] sm:$0xff]  ;;  %vm2403_vm5 = vcmask 64512  }
  0x6f   :  { %2696 = vmatprep.subr.mxu1 %v3184_v0  ;;  %2691 = vmatprep.mubr.msk.f32.mxu0 %vm3185_vm0, %v3184_v0  ;;  %v2533_v54 = vld [vmem:[%s3627_s1 + $0x2] sm:$0x3]  ;;  %v478_v55 = vld [vmem:[#allocation8 + $0x38] sm:$0x3]  ;;  %v477_v56 = vld [vmem:[#allocation8 + $0x30] sm:$0xff] }
  0x70   :  { %2697 = vmatpush3.msra.mxu1 %v396_v8  ;;  %2688 = vmatpush3.msk.msra.mxu0 %vm238_vm1, %v316_v52  ;;  %v2539_v57 = vld [vmem:[%s3627_s1 + $0x6] sm:$0x3]  ;;  %v640_v58 = vld [vmem:[#allocation8 + $0x58] sm:$0x3]  ;;  %v2545_v60 = vld [vmem:[%s3627_s1 + $0xa] sm:$0x3] }
  0x71   :  { %2699 = vmatmul.mubr.msk.f32.vlgmr.msra.gmra.mxu1 %vm234_vm3, %v2536_v9  ;;  %2708 = vmatprep.subr.mxu1 %v3184_v0  ;;  %v639_v59 = vld [vmem:[#allocation8 + $0x50] sm:$0xff]  ;;  %v802_v62 = vld [vmem:[#allocation8 + $0x78] sm:$0x3]  ;;  %v2557_v4 = vld [vmem:[%s3627_s1 + $0x12] sm:$0x3] }
  0x72   :  { %2709 = vmatpush3.msk.msra.mxu1 %vm238_vm1, %v559_v10  ;;  %2712 = vmatprep.mubr.msk.f32.mxu1 %vm3185_vm0, %v3184_v0  ;;  %v801_v63 = vld [vmem:[#allocation8 + $0x70] sm:$0xff]  ;;  %v2551_v1 = vld [vmem:[%s3627_s1 + $0xe] sm:$0x3]  ;;  %s3189_s1 = smov 98   ;;  %v1254_v9 = vld [vmem:[#allocation5 + $0x2] sm:$0x3] }
  0x73   :  { %2710 = vmatprep.subr.mxu1 %v3184_v0  ;;  %2689 = vmatprep.subr.mxu0 %v3184_v0  ;;  %v964_v2 = vld [vmem:[#allocation8 + $0x98] sm:$0x3]  ;;  %v963_v3 = vld [vmem:[#allocation8 + $0x90] sm:$0xff] }
  0x74   :  { %2711 = vmatpush3.msra.mxu1 %v558_v11  ;;  %2690 = vmatpush3.msra.mxu0 %v315_v53  ;;  %v1158_v5 = vld [vmem:[#allocation7 + $0x18] sm:$0x3]  ;;  %v1157_v6 = vld [vmem:[#allocation7 + $0x10] sm:$0xff] }
  0x75   :  { %2713 = vmatmul.mubr.msk.f32.vlgmr.msra.gmra.mxu1 %vm234_vm3, %v2542_v12  ;;  %2722 = vmatprep.subr.mxu1 %v3184_v0 }
  0x76   :  { %2723 = vmatpush3.msk.msra.mxu1 %vm238_vm1, %v721_v13  ;;  %2726 = vmatprep.mubr.msk.f32.mxu1 %vm3185_vm0, %v3184_v0 }
  0x77   :  { %2724 = vmatprep.subr.mxu1 %v3184_v0  ;;  %2692 = vmatmul.mubr.msk.f32.vlgmr.msra.gmra.mxu0 %vm234_vm3, %v2533_v54 }
  0x78   :  { %2725 = vmatpush3.msra.mxu1 %v720_v14  ;;  %2701 = vmatprep.subr.mxu0 %v3184_v0 }
  0x79   :  { %2727 = vmatmul.mubr.msk.f32.vlgmr.msra.gmra.mxu1 %vm234_vm3, %v2548_v15  ;;  %2736 = vmatprep.subr.mxu1 %v3184_v0 }
  0x7a   :  { %2737 = vmatpush3.msk.msra.mxu1 %vm238_vm1, %v883_v16  ;;  %2740 = vmatprep.mubr.msk.f32.mxu1 %vm3185_vm0, %v3184_v0 }
  0x7b   :  { %2738 = vmatprep.subr.mxu1 %v3184_v0  ;;  %2702 = vmatpush3.msk.msra.mxu0 %vm238_vm1, %v478_v55 }
  0x7c   :  { %2739 = vmatpush3.msra.mxu1 %v882_v17  ;;  %2705 = vmatprep.mubr.msk.f32.mxu0 %vm3185_vm0, %v3184_v0 }
  0x7d   :  { %2741 = vmatmul.mubr.msk.f32.vlgmr.msra.gmra.mxu1 %vm234_vm3, %v2554_v18  ;;  %2750 = vmatprep.subr.mxu1 %v3184_v0 }
  0x7e   :  { %2751 = vmatpush3.msk.msra.mxu1 %vm238_vm1, %v1042_v19  ;;  %2754 = vmatprep.mubr.msk.f32.mxu1 %vm3185_vm0, %v3184_v0 }
  0x7f   :  { %2752 = vmatprep.subr.mxu1 %v3184_v0  ;;  %2703 = vmatprep.subr.mxu0 %v3184_v0 }
  0x80   :  { %2753 = vmatpush3.msra.mxu1 %v1041_v20  ;;  %2704 = vmatpush3.msra.mxu0 %v477_v56 }
  0x81   :  { %2764 = vmatprep.subr.mxu1 %v3184_v0  ;;  %2706 = vmatmul.mubr.msk.f32.vlgmr.msra.gmra.mxu0 %vm234_vm3, %v2539_v57 }
  0x82   :  { %2715 = vmatprep.subr.mxu0 %v3184_v0  ;;  %2719 = vmatprep.mubr.msk.f32.mxu0 %vm3185_vm0, %v3184_v0 }
  0x83   :  { %2716 = vmatpush3.msk.msra.mxu0 %vm238_vm1, %v640_v58 }
  0x84   :  { %2717 = vmatprep.subr.mxu0 %v3184_v0 }
  0x85   :  { %2718 = vmatpush3.msra.mxu0 %v639_v59 }
  0x86   :  { %2720 = vmatmul.mubr.msk.f32.vlgmr.msra.gmra.mxu0 %vm234_vm3, %v2545_v60  ;;  %2729 = vmatprep.subr.mxu0 %v3184_v0 }
  0x87   :  { %2730 = vmatpush3.msk.msra.mxu0 %vm238_vm1, %v802_v62  ;;  %2733 = vmatprep.mubr.msk.f32.mxu0 %vm3185_vm0, %v3184_v0 }
  0x88   :  { %2731 = vmatprep.subr.mxu0 %v3184_v0 }
  0x89   :  { %2732 = vmatpush3.msra.mxu0 %v801_v63 }
  0x8a   :  { %2734 = vmatmul.mubr.msk.f32.vlgmr.msra.gmra.mxu0 %vm234_vm3, %v2551_v1  ;;  %2743 = vmatprep.subr.mxu0 %v3184_v0  ;;  %v1398_v1 = vld [vmem:[#allocation7 + $0x38] sm:$0x3] }
  0x8b   :  { %2744 = vmatpush3.msk.msra.mxu0 %vm238_vm1, %v964_v2  ;;  %2747 = vmatprep.mubr.msk.f32.mxu0 %vm3185_vm0, %v3184_v0  ;;  %v1397_v2 = vld [vmem:[#allocation7 + $0x30] sm:$0xff] }
  0x8c   :  { %2745 = vmatprep.subr.mxu0 %v3184_v0 }
  0x8d   :  { %2746 = vmatpush3.msra.mxu0 %v963_v3 }
  0x8e   :  { %2748 = vmatmul.mubr.msk.f32.vlgmr.msra.gmra.mxu0 %vm234_vm3, %v2557_v4  ;;  %2757 = vmatprep.subr.mxu0 %v3184_v0 }
  0x8f   :  { %2758 = vmatpush3.msk.msra.mxu0 %vm238_vm1, %v1158_v5  ;;  %2761 = vmatprep.mubr.msk.f32.mxu0 %vm3185_vm0, %v3184_v0 }
  0x90   :  { %2759 = vmatprep.subr.mxu0 %v3184_v0 }
  0x91   :  { %2760 = vmatpush3.msra.mxu0 %v1157_v6  ;;  %v1494_v6 = vld [vmem:[#allocation5 + $0x6] sm:$0x3] }
  0x92   :  { %2771 = vmatprep.subr.mxu0 %v3184_v0 }
 0x12c   :  { %v227_v22 = vpop.f32.mrf.mxu0  ;;  %v308_v24 = vpop.f32.mrf.mxu1 }
 0x12d   :  { %v228_v23 = vadd.f32 %v2529_v21, %v227_v22  ;;  %v2566_v22 = vld [vmem:[#allocation10 + $0x1] ss:$0 sm:$0xff] }
 0x12e   :  { %v2679_v25 = vpop.f32.mrf.mxu0  ;;  %v2686_v26 = vpop.f32.mrf.mxu1 }
 0x12f   :  { %2755 = vmatmul.mubr.msk.f32.vlgmr.msra.gmra.mxu1 %vm234_vm3, %v228_v23 }
 0x130   :  { %2768 = vmatprep.mubr.msk.f32.mxu1 %vm3185_vm0, %v3184_v0 }
 0x131   :  { %v3372_v27 = vpop.f32.mrf.mxu1 }
 0x133   :  { %v2700_v28 = vpop.f32.mrf.mxu1 }
 0x135   :  { %v3374_v29 = vpop.f32.mrf.mxu1 }
 0x137   :  { %v2714_v30 = vpop.f32.mrf.mxu1  ;;  %v389_v10 = vpop.f32.mrf.mxu0 }
 0x139   :  { %v3376_v31 = vpop.f32.mrf.mxu1  ;;  %v2693_v11 = vpop.f32.mrf.mxu0 }
 0x13b   :  { %v2728_v32 = vpop.f32.mrf.mxu1 }
 0x13d   :  { %v3378_v33 = vpop.f32.mrf.mxu1 }
 0x13f   :  { %v2742_v34 = vpop.f32.mrf.mxu1 }
 0x141   :  { %v3442_v12 = vpop.f32.mrf.mxu0 }
 0x143   :  { %v2707_v13 = vpop.f32.mrf.mxu0 }
 0x146   :  { %v3444_v14 = vpop.f32.mrf.mxu0 }
 0x148   :  { %v2721_v15 = vpop.f32.mrf.mxu0 }
 0x14a   :  { %v3446_v16 = vpop.f32.mrf.mxu0 }
 0x14c   :  { %v2735_v17 = vpop.f32.mrf.mxu0 }
 0x14e   :  { %v3448_v18 = vpop.f32.mrf.mxu0 }
 0x150   :  { %v2749_v19 = vpop.f32.mrf.mxu0 }
 0x1ef   :  { %v1115_v35 = vpop.f32.mrf.mxu1 }
 0x1f0   :  { %v1116_v37 = vadd.f32 %v1115_v35, %v308_v24 }
 0x1f1   :  { %v2756_v38 = vpop.f32.mrf.mxu1 }
 0x1f2   :  { %v1126_v39 = vadd.f32 %v2562_v36, %v1116_v37 }
 0x1f4   :  { %2856 = vtanh.f32 %v1126_v39  ;;  %v2563_v42 = vmul.f32 -1.442695, %v1126_v39 }
 0x1f6   :  { %2858 = vpow2.f32 %v2563_v42  ;;  %v1277_v42 = vld [vmem:[#allocation7 + $0x20] sm:$0xff] }
 0x201   :  { %v2857_v40 = vpop.eup %2856 }
 0x202   :  { %1141 = vrot.lane.b32.xlu0 %v2857_v40, %s3186_s4 }
 0x203   :  { %v2859_v43 = vpop.eup %2858 }
 0x204   :  { %v1130_v44 = vadd.f32 1.0, %v2859_v43 }
 0x206   :  { %1136 = vrot.lane.b32.xlu0 %v1134_v41, %s3187_s25  ;;  %2860 = vrcp.f32 %v1130_v44  ;;  %v1278_v41 = vld [vmem:[#allocation7 + $0x28] sm:$0x3] }
 0x207   :  { %2765 = vmatpush3.msk.msra.mxu1 %vm238_vm1, %v1278_v41 }
 0x208   :  { %2766 = vmatprep.subr.mxu1 %v3184_v0 }
 0x209   :  { %2767 = vmatpush3.msra.mxu1 %v1277_v42 }
 0x20a   :  { %2778 = vmatprep.subr.mxu1 %v3184_v0 }
 0x213   :  { %v3382_v45 = vpop.eup %2860 }
 0x274   :  { %v1142_v46 = vpop.permute.xlu0 %1141 }
 0x275   :  { %v1144_v47 = vmul.f32 %v3382_v45, %v1142_v46  ;;  %v1374_v46 = vld [vmem:[#allocation5 + $0x4] sm:$0x3] }
 0x277   :  { %1146 = vrot.lane.b32.xlu1 %v1144_v47, %s3187_s25 }
 0x278   :  { %v1137_v48 = vpop.permute.xlu0 %1136 }
 0x279   :  { %v1139_v49 = vmul.f32 %v3382_v45, %v1137_v48 }
 0x2e9   :  { %v1147_v50 = vpop.permute.xlu1 %1146 }
 0x2ea   :  { %v3387_v51 = vadd.f32 %v1147_v50, %v1139_v49  ;;  %v2570_v49 = vld [vmem:[#allocation10 + $0x2] ss:$0 sm:$0xff] }
 0x2ec   :  { %2862 = vtanh.f32 %v3387_v51 }
 0x2f9   :  { %v2863_v61 = vpop.eup %2862 }
 0x2fa   :  { %1152 = vrot.lane.b32.xlu1 %v2863_v61, %s3188_s10 }
 0x36c   :  { %v1153_v7 = vpop.permute.xlu1 %1152 }
 0x36d   :  { %v1155_v8 = vmul.f32 %v3382_v45, %v1153_v7 }
 0x36f   :  { %1160 = vrot.lane.b32.xlu0 %v1155_v8, %s3189_s1 }
 0x373   :  { %1256 = vrot.lane.b32.xlu0 %v1254_v9, %s3187_s25  ;;  %v2574_v9 = vld [vmem:[#allocation10 + $0x3] ss:$0 sm:$0xff] }
 0x3e1   :  { %v1161_v20 = vpop.permute.xlu0 %1160 }
 0x3e2   :  { %2250 = vst.msk [vmem:[#allocation17] sm:$0x3] %vm2249_vm4, %v1161_v20  ;;  %2762 = vmatmul.mubr.msk.f32.vlgmr.msra.gmra.mxu0 %vm234_vm3, %v1161_v20 }
 0x3e3   :  { %2775 = vmatprep.mubr.msk.f32.mxu0 %vm3185_vm0, %v3184_v0  ;;  %2772 = vmatpush3.msk.msra.mxu0 %vm238_vm1, %v1398_v1 }
 0x3e4   :  { %2773 = vmatprep.subr.mxu0 %v3184_v0 }
 0x3e5   :  { %v1257_v37 = vpop.permute.xlu0 %1256  ;;  %2774 = vmatpush3.msra.mxu0 %v1397_v2 }
 0x3e6   :  { %2785 = vmatprep.subr.mxu0 %v3184_v0 }
 0x4a2   :  { %v1233_v21 = vpop.f32.mrf.mxu0 }
 0x4a3   :  { %v1234_v23 = vadd.f32 %v1233_v21, %v389_v10 }
 0x4a4   :  { %v2763_v24 = vpop.f32.mrf.mxu0 }
 0x4a5   :  { %v1245_v25 = vadd.f32 %v2566_v22, %v1234_v23 }
 0x4a7   :  { %2864 = vtanh.f32 %v1245_v25  ;;  %v2567_v28 = vmul.f32 -1.442695, %v1245_v25 }
 0x4a9   :  { %2866 = vpow2.f32 %v2567_v28  ;;  %v1518_v28 = vld [vmem:[#allocation7 + $0x48] sm:$0x3] }
 0x4b4   :  { %v2865_v26 = vpop.eup %2864 }
 0x4b5   :  { %1261 = vrot.lane.b32.xlu1 %v2865_v26, %s3186_s4 }
 0x4b6   :  { %v2867_v30 = vpop.eup %2866 }
 0x4b7   :  { %v1249_v32 = vadd.f32 1.0, %v2867_v30  ;;  %v1517_v30 = vld [vmem:[#allocation7 + $0x40] sm:$0xff] }
 0x4b9   :  { %2868 = vrcp.f32 %v1249_v32 }
 0x4c6   :  { %v2869_v34 = vpop.eup %2868 }
 0x4c7   :  { %v1259_v38 = vmul.f32 %v2869_v34, %v1257_v37 }
 0x527   :  { %v1262_v35 = vpop.permute.xlu1 %1261 }
 0x528   :  { %v1264_v36 = vmul.f32 %v2869_v34, %v1262_v35 }
 0x52a   :  { %1266 = vrot.lane.b32.xlu1 %v1264_v36, %s3187_s25  ;;  %v1614_v36 = vld [vmem:[#allocation5 + $0x8] sm:$0x3] }
 0x59c   :  { %v1267_v39 = vpop.permute.xlu1 %1266 }
 0x59d   :  { %v3456_v40 = vadd.f32 %v1267_v39, %v1259_v38  ;;  %v2578_v39 = vld [vmem:[#allocation10 + $0x4] ss:$0 sm:$0xff] }
 0x59f   :  { %2870 = vtanh.f32 %v3456_v40 }
 0x5ac   :  { %v2871_v43 = vpop.eup %2870 }
 0x5ad   :  { %1272 = vrot.lane.b32.xlu0 %v2871_v43, %s3188_s10 }
 0x61f   :  { %v1273_v44 = vpop.permute.xlu0 %1272 }
 0x620   :  { %v1275_v45 = vmul.f32 %v2869_v34, %v1273_v44 }
 0x622   :  { %1280 = vrot.lane.b32.xlu1 %v1275_v45, %s3189_s1 }
 0x626   :  { %1376 = vrot.lane.b32.xlu1 %v1374_v46, %s3187_s25 }
 0x694   :  { %v1281_v47 = vpop.permute.xlu1 %1280 }
 0x695   :  { %2251 = vst.msk [vmem:[#allocation17 + $0x2] sm:$0x3] %vm2249_vm4, %v1281_v47  ;;  %2769 = vmatmul.mubr.msk.f32.vlgmr.msra.gmra.mxu1 %vm234_vm3, %v1281_v47 }
 0x696   :  { %2782 = vmatprep.mubr.msk.f32.mxu1 %vm3185_vm0, %v3184_v0  ;;  %2779 = vmatpush3.msk.msra.mxu1 %vm238_vm1, %v1518_v28 }
 0x697   :  { %2780 = vmatprep.subr.mxu1 %v3184_v0 }
 0x698   :  { %v1377_v61 = vpop.permute.xlu1 %1376  ;;  %2781 = vmatpush3.msra.mxu1 %v1517_v30 }
 0x699   :  { %2792 = vmatprep.subr.mxu1 %v3184_v0 }
 0x755   :  { %v1353_v48 = vpop.f32.mrf.mxu1 }
 0x756   :  { %v1354_v50 = vadd.f32 %v1353_v48, %v3372_v27 }
 0x757   :  { %v2770_v52 = vpop.f32.mrf.mxu1 }
 0x758   :  { %v1365_v53 = vadd.f32 %v2570_v49, %v1354_v50 }
 0x75a   :  { %2872 = vtanh.f32 %v1365_v53  ;;  %v2571_v55 = vmul.f32 -1.442695, %v1365_v53 }
 0x75c   :  { %2874 = vpow2.f32 %v2571_v55  ;;  %v1638_v55 = vld [vmem:[#allocation7 + $0x58] sm:$0x3] }
 0x767   :  { %v2873_v54 = vpop.eup %2872 }
 0x768   :  { %1381 = vrot.lane.b32.xlu0 %v2873_v54, %s3186_s4 }
 0x769   :  { %v2875_v56 = vpop.eup %2874 }
 0x76a   :  { %v1369_v57 = vadd.f32 1.0, %v2875_v56  ;;  %v1637_v56 = vld [vmem:[#allocation7 + $0x50] sm:$0xff] }
 0x76c   :  { %2876 = vrcp.f32 %v1369_v57 }
 0x779   :  { %v2877_v58 = vpop.eup %2876 }
 0x77a   :  { %v1379_v62 = vmul.f32 %v2877_v58, %v1377_v61 }
 0x7da   :  { %v1382_v59 = vpop.permute.xlu0 %1381 }
 0x7db   :  { %v1384_v60 = vmul.f32 %v2877_v58, %v1382_v59 }
 0x7dd   :  { %1386 = vrot.lane.b32.xlu0 %v1384_v60, %s3187_s25  ;;  %v1734_v60 = vld [vmem:[#allocation5 + $0xa] sm:$0x3] }
 0x84f   :  { %v1387_v63 = vpop.permute.xlu0 %1386 }
 0x850   :  { %v3472_v27 = vadd.f32 %v1387_v63, %v1379_v62  ;;  %v2582_v63 = vld [vmem:[#allocation10 + $0x5] ss:$0 sm:$0xff] }
 0x852   :  { %2878 = vtanh.f32 %v3472_v27 }
 0x85f   :  { %v2879_v3 = vpop.eup %2878 }
 0x860   :  { %1392 = vrot.lane.b32.xlu1 %v2879_v3, %s3188_s10 }
 0x8d2   :  { %v1393_v4 = vpop.permute.xlu1 %1392 }
 0x8d3   :  { %v1395_v5 = vmul.f32 %v2877_v58, %v1393_v4 }
 0x8d5   :  { %1400 = vrot.lane.b32.xlu0 %v1395_v5, %s3189_s1 }
 0x8d9   :  { %1496 = vrot.lane.b32.xlu0 %v1494_v6, %s3187_s25 }
 0x947   :  { %v1401_v7 = vpop.permute.xlu0 %1400 }
 0x948   :  { %2252 = vst.msk [vmem:[#allocation17 + $0x4] sm:$0x3] %vm2249_vm4, %v1401_v7  ;;  %2776 = vmatmul.mubr.msk.f32.vlgmr.msra.gmra.mxu0 %vm234_vm3, %v1401_v7 }
 0x949   :  { %2789 = vmatprep.mubr.msk.f32.mxu0 %vm3185_vm0, %v3184_v0  ;;  %2786 = vmatpush3.msk.msra.mxu0 %vm238_vm1, %v1638_v55 }
 0x94a   :  { %2787 = vmatprep.subr.mxu0 %v3184_v0 }
 0x94b   :  { %v1497_v24 = vpop.permute.xlu0 %1496  ;;  %2788 = vmatpush3.msra.mxu0 %v1637_v56 }
 0x94c   :  { %2799 = vmatprep.subr.mxu0 %v3184_v0 }
 0xa08   :  { %v1473_v8 = vpop.f32.mrf.mxu0 }
 0xa09   :  { %v1474_v10 = vadd.f32 %v1473_v8, %v3442_v12 }
 0xa0a   :  { %v2777_v11 = vpop.f32.mrf.mxu0 }
 0xa0b   :  { %v1485_v13 = vadd.f32 %v2574_v9, %v1474_v10 }
 0xa0d   :  { %2880 = vtanh.f32 %v1485_v13  ;;  %v2575_v17 = vmul.f32 -1.442695, %v1485_v13 }
 0xa0f   :  { %2882 = vpow2.f32 %v2575_v17  ;;  %v1758_v17 = vld [vmem:[#allocation7 + $0x68] sm:$0x3] }
 0xa1a   :  { %v2881_v15 = vpop.eup %2880 }
 0xa1b   :  { %1501 = vrot.lane.b32.xlu1 %v2881_v15, %s3186_s4 }
 0xa1c   :  { %v2883_v19 = vpop.eup %2882 }
 0xa1d   :  { %v1489_v20 = vadd.f32 1.0, %v2883_v19  ;;  %v1757_v19 = vld [vmem:[#allocation7 + $0x60] sm:$0xff] }
 0xa1f   :  { %2884 = vrcp.f32 %v1489_v20 }
 0xa2c   :  { %v2885_v21 = vpop.eup %2884 }
 0xa2d   :  { %v1499_v25 = vmul.f32 %v2885_v21, %v1497_v24 }
 0xa8d   :  { %v1502_v22 = vpop.permute.xlu1 %1501 }
 0xa8e   :  { %v1504_v23 = vmul.f32 %v2885_v21, %v1502_v22 }
 0xa90   :  { %1506 = vrot.lane.b32.xlu1 %v1504_v23, %s3187_s25  ;;  %v1854_v23 = vld [vmem:[#allocation5 + $0xc] sm:$0x3] }
 0xb02   :  { %v1507_v26 = vpop.permute.xlu1 %1506 }
 0xb03   :  { %v3488_v12 = vadd.f32 %v1507_v26, %v1499_v25  ;;  %v2586_v26 = vld [vmem:[#allocation10 + $0x6] ss:$0 sm:$0xff] }
 0xb05   :  { %2886 = vtanh.f32 %v3488_v12 }
 0xb12   :  { %v2887_v32 = vpop.eup %2886 }
 0xb13   :  { %1512 = vrot.lane.b32.xlu0 %v2887_v32, %s3188_s10 }
 0xb85   :  { %v1513_v34 = vpop.permute.xlu0 %1512 }
 0xb86   :  { %v1515_v35 = vmul.f32 %v2885_v21, %v1513_v34 }
 0xb88   :  { %1520 = vrot.lane.b32.xlu1 %v1515_v35, %s3189_s1 }
 0xb8c   :  { %1616 = vrot.lane.b32.xlu1 %v1614_v36, %s3187_s25 }
 0xbfa   :  { %v1521_v37 = vpop.permute.xlu1 %1520 }
 0xbfb   :  { %2253 = vst.msk [vmem:[#allocation17 + $0x6] sm:$0x3] %vm2249_vm4, %v1521_v37  ;;  %2783 = vmatmul.mubr.msk.f32.vlgmr.msra.gmra.mxu1 %vm234_vm3, %v1521_v37 }
 0xbfc   :  { %2796 = vmatprep.mubr.msk.f32.mxu1 %vm3185_vm0, %v3184_v0  ;;  %2793 = vmatpush3.msk.msra.mxu1 %vm238_vm1, %v1758_v17 }
 0xbfd   :  { %2794 = vmatprep.subr.mxu1 %v3184_v0 }
 0xbfe   :  { %v1617_v52 = vpop.permute.xlu1 %1616  ;;  %2795 = vmatpush3.msra.mxu1 %v1757_v19 }
 0xbff   :  { %2806 = vmatprep.subr.mxu1 %v3184_v0 }
 0xcbb   :  { %v1593_v38 = vpop.f32.mrf.mxu1 }
 0xcbc   :  { %v1594_v41 = vadd.f32 %v1593_v38, %v3374_v29 }
 0xcbd   :  { %v2784_v42 = vpop.f32.mrf.mxu1 }
 0xcbe   :  { %v1605_v43 = vadd.f32 %v2578_v39, %v1594_v41 }
 0xcc0   :  { %2888 = vtanh.f32 %v1605_v43  ;;  %v2579_v45 = vmul.f32 -1.442695, %v1605_v43 }
 0xcc2   :  { %2890 = vpow2.f32 %v2579_v45  ;;  %v1878_v45 = vld [vmem:[#allocation7 + $0x78] sm:$0x3] }
 0xccd   :  { %v2889_v44 = vpop.eup %2888 }
 0xcce   :  { %1621 = vrot.lane.b32.xlu0 %v2889_v44, %s3186_s4 }
 0xccf   :  { %v2891_v46 = vpop.eup %2890 }
 0xcd0   :  { %v1609_v47 = vadd.f32 1.0, %v2891_v46  ;;  %v1877_v46 = vld [vmem:[#allocation7 + $0x70] sm:$0xff] }
 0xcd2   :  { %2892 = vrcp.f32 %v1609_v47 }
 0xcdf   :  { %v2893_v48 = vpop.eup %2892 }
 0xce0   :  { %v1619_v53 = vmul.f32 %v2893_v48, %v1617_v52 }
 0xd40   :  { %v1622_v49 = vpop.permute.xlu0 %1621 }
 0xd41   :  { %v1624_v50 = vmul.f32 %v2893_v48, %v1622_v49 }
 0xd43   :  { %1626 = vrot.lane.b32.xlu0 %v1624_v50, %s3187_s25  ;;  %v1974_v50 = vld [vmem:[#allocation5 + $0xe] sm:$0x3] }
 0xdb5   :  { %v1627_v54 = vpop.permute.xlu0 %1626 }
 0xdb6   :  { %v3504_v29 = vadd.f32 %v1627_v54, %v1619_v53  ;;  %v2590_v54 = vld [vmem:[#allocation10 + $0x7] ss:$0 sm:$0xff] }
 0xdb8   :  { %2894 = vtanh.f32 %v3504_v29 }
 0xdc5   :  { %v2895_v57 = vpop.eup %2894 }
 0xdc6   :  { %1632 = vrot.lane.b32.xlu1 %v2895_v57, %s3188_s10 }
 0xe38   :  { %v1633_v58 = vpop.permute.xlu1 %1632 }
 0xe39   :  { %v1635_v59 = vmul.f32 %v2893_v48, %v1633_v58 }
 0xe3b   :  { %1640 = vrot.lane.b32.xlu0 %v1635_v59, %s3189_s1 }
 0xe3f   :  { %1736 = vrot.lane.b32.xlu0 %v1734_v60, %s3187_s25 }
 0xead   :  { %v1641_v61 = vpop.permute.xlu0 %1640 }
 0xeae   :  { %2254 = vst.msk [vmem:[#allocation17 + $0x8] sm:$0x3] %vm2249_vm4, %v1641_v61  ;;  %2790 = vmatmul.mubr.msk.f32.vlgmr.msra.gmra.mxu0 %vm234_vm3, %v1641_v61 }
 0xeaf   :  { %2803 = vmatprep.mubr.msk.f32.mxu0 %vm3185_vm0, %v3184_v0  ;;  %2800 = vmatpush3.msk.msra.mxu0 %vm238_vm1, %v1878_v45 }
 0xeb0   :  { %2801 = vmatprep.subr.mxu0 %v3184_v0 }
 0xeb1   :  { %v1737_v11 = vpop.permute.xlu0 %1736  ;;  %2802 = vmatpush3.msra.mxu0 %v1877_v46 }
 0xeb2   :  { %2813 = vmatprep.subr.mxu0 %v3184_v0 }
 0xf6e   :  { %v1713_v62 = vpop.f32.mrf.mxu0 }
 0xf6f   :  { %v1714_v1 = vadd.f32 %v1713_v62, %v3444_v14 }
 0xf70   :  { %v2791_v2 = vpop.f32.mrf.mxu0 }
 0xf71   :  { %v1725_v3 = vadd.f32 %v2582_v63, %v1714_v1 }
 0xf73   :  { %2896 = vtanh.f32 %v1725_v3  ;;  %v2583_v5 = vmul.f32 -1.442695, %v1725_v3 }
 0xf75   :  { %2898 = vpow2.f32 %v2583_v5  ;;  %v1998_v5 = vld [vmem:[#allocation7 + $0x88] sm:$0x3] }
 0xf80   :  { %v2897_v4 = vpop.eup %2896 }
 0xf81   :  { %1741 = vrot.lane.b32.xlu1 %v2897_v4, %s3186_s4 }
 0xf82   :  { %v2899_v6 = vpop.eup %2898 }
 0xf83   :  { %v1729_v7 = vadd.f32 1.0, %v2899_v6  ;;  %v1997_v6 = vld [vmem:[#allocation7 + $0x80] sm:$0xff] }
 0xf85   :  { %2900 = vrcp.f32 %v1729_v7 }
 0xf92   :  { %v2901_v8 = vpop.eup %2900 }
 0xf93   :  { %v1739_v13 = vmul.f32 %v2901_v8, %v1737_v11 }
 0xff3   :  { %v1742_v9 = vpop.permute.xlu1 %1741 }
 0xff4   :  { %v1744_v10 = vmul.f32 %v2901_v8, %v1742_v9 }
 0xff6   :  { %1746 = vrot.lane.b32.xlu1 %v1744_v10, %s3187_s25  ;;  %v2094_v10 = vld [vmem:[#allocation5 + $0x10] sm:$0x3] }
0x1068   :  { %v1747_v15 = vpop.permute.xlu1 %1746 }
0x1069   :  { %v3520_v14 = vadd.f32 %v1747_v15, %v1739_v13  ;;  %v2594_v15 = vld [vmem:[#allocation10 + $0x8] ss:$0 sm:$0xff] }
0x106b   :  { %2902 = vtanh.f32 %v3520_v14 }
0x1078   :  { %v2903_v20 = vpop.eup %2902 }
0x1079   :  { %1752 = vrot.lane.b32.xlu0 %v2903_v20, %s3188_s10 }
0x10eb   :  { %v1753_v21 = vpop.permute.xlu0 %1752 }
0x10ec   :  { %v1755_v22 = vmul.f32 %v2901_v8, %v1753_v21 }
0x10ee   :  { %1760 = vrot.lane.b32.xlu1 %v1755_v22, %s3189_s1 }
0x10f2   :  { %1856 = vrot.lane.b32.xlu1 %v1854_v23, %s3187_s25 }
0x1160   :  { %v1761_v24 = vpop.permute.xlu1 %1760 }
0x1161   :  { %2255 = vst.msk [vmem:[#allocation17 + $0xa] sm:$0x3] %vm2249_vm4, %v1761_v24  ;;  %2797 = vmatmul.mubr.msk.f32.vlgmr.msra.gmra.mxu1 %vm234_vm3, %v1761_v24 }
0x1162   :  { %2810 = vmatprep.mubr.msk.f32.mxu1 %vm3185_vm0, %v3184_v0  ;;  %2807 = vmatpush3.msk.msra.mxu1 %vm238_vm1, %v1998_v5 }
0x1163   :  { %2808 = vmatprep.subr.mxu1 %v3184_v0 }
0x1164   :  { %v1857_v42 = vpop.permute.xlu1 %1856  ;;  %2809 = vmatpush3.msra.mxu1 %v1997_v6 }
0x1165   :  { %2820 = vmatprep.subr.mxu1 %v3184_v0 }
0x1221   :  { %v1833_v25 = vpop.f32.mrf.mxu1 }
0x1222   :  { %v1834_v28 = vadd.f32 %v1833_v25, %v3376_v31 }
0x1223   :  { %v2798_v30 = vpop.f32.mrf.mxu1 }
0x1224   :  { %v1845_v32 = vadd.f32 %v2586_v26, %v1834_v28 }
0x1226   :  { %2904 = vtanh.f32 %v1845_v32  ;;  %v2587_v35 = vmul.f32 -1.442695, %v1845_v32 }
0x1228   :  { %2906 = vpow2.f32 %v2587_v35  ;;  %v2118_v35 = vld [vmem:[#allocation7 + $0x98] sm:$0x3] }
0x1233   :  { %v2905_v34 = vpop.eup %2904 }
0x1234   :  { %1861 = vrot.lane.b32.xlu0 %v2905_v34, %s3186_s4 }
0x1235   :  { %v2907_v36 = vpop.eup %2906 }
0x1236   :  { %v1849_v37 = vadd.f32 1.0, %v2907_v36  ;;  %v2117_v36 = vld [vmem:[#allocation7 + $0x90] sm:$0xff] }
0x1238   :  { %2908 = vrcp.f32 %v1849_v37 }
0x1245   :  { %v2909_v38 = vpop.eup %2908 }
0x1246   :  { %v1859_v43 = vmul.f32 %v2909_v38, %v1857_v42 }
0x12a6   :  { %v1862_v39 = vpop.permute.xlu0 %1861 }
0x12a7   :  { %v1864_v41 = vmul.f32 %v2909_v38, %v1862_v39 }
0x12a9   :  { %1866 = vrot.lane.b32.xlu0 %v1864_v41, %s3187_s25  ;;  %v2214_v41 = vld [vmem:[#allocation5 + $0x12] sm:$0x3] }
0x131b   :  { %v1867_v44 = vpop.permute.xlu0 %1866 }
0x131c   :  { %v3536_v31 = vadd.f32 %v1867_v44, %v1859_v43  ;;  %v2598_v44 = vld [vmem:[#allocation10 + $0x9] ss:$0 sm:$0xff] }
0x131e   :  { %2910 = vtanh.f32 %v3536_v31 }
0x132b   :  { %v2911_v47 = vpop.eup %2910 }
0x132c   :  { %1872 = vrot.lane.b32.xlu1 %v2911_v47, %s3188_s10 }
0x139e   :  { %v1873_v48 = vpop.permute.xlu1 %1872 }
0x139f   :  { %v1875_v49 = vmul.f32 %v2909_v38, %v1873_v48 }
0x13a1   :  { %1880 = vrot.lane.b32.xlu0 %v1875_v49, %s3189_s1 }
0x13a5   :  { %1976 = vrot.lane.b32.xlu0 %v1974_v50, %s3187_s25 }
0x1413   :  { %v1881_v52 = vpop.permute.xlu0 %1880 }
0x1414   :  { %2256 = vst.msk [vmem:[#allocation17 + $0xc] sm:$0x3] %vm2249_vm4, %v1881_v52  ;;  %2804 = vmatmul.mubr.msk.f32.vlgmr.msra.gmra.mxu0 %vm234_vm3, %v1881_v52 }
0x1415   :  { %2817 = vmatprep.mubr.msk.f32.mxu0 %vm3185_vm0, %v3184_v0  ;;  %2814 = vmatpush3.msk.msra.mxu0 %vm238_vm1, %v2118_v35 }
0x1416   :  { %2815 = vmatprep.subr.mxu0 %v3184_v0 }
0x1417   :  { %v1977_v2 = vpop.permute.xlu0 %1976  ;;  %2816 = vmatpush3.msra.mxu0 %v2117_v36 }
0x1418   :  { %2827 = vmatprep.subr.mxu0 %v3184_v0 }
0x14d4   :  { %v1953_v53 = vpop.f32.mrf.mxu0 }
0x14d5   :  { %v1954_v55 = vadd.f32 %v1953_v53, %v3446_v16 }
0x14d6   :  { %v2805_v56 = vpop.f32.mrf.mxu0 }
0x14d7   :  { %v1965_v57 = vadd.f32 %v2590_v54, %v1954_v55 }
0x14d9   :  { %2912 = vtanh.f32 %v1965_v57  ;;  %v2591_v59 = vmul.f32 -1.442695, %v1965_v57 }
0x14db   :  { %2914 = vpow2.f32 %v2591_v59 }
0x14e6   :  { %v2913_v58 = vpop.eup %2912 }
0x14e7   :  { %1981 = vrot.lane.b32.xlu1 %v2913_v58, %s3186_s4 }
0x14e8   :  { %v2915_v60 = vpop.eup %2914 }
0x14e9   :  { %v1969_v61 = vadd.f32 1.0, %v2915_v60  ;;  %v2311_v60 = vld [vmem:[%s3634_s8 + $0x8] sm:$0x3] }
0x14eb   :  { %2916 = vrcp.f32 %v1969_v61  ;;  %v2310_v61 = vld [vmem:[%s3634_s8] sm:$0xff]  ;;  %s3191_s8 = smov [#allocation17]  }
0x14ec   :  { %s2494_s15 = sshll.u32 %s3191_s8, 4  ;;  %s2495_s15 = int_to_ptr.vmem [resolvable:$true] %s2494_s15 }
0x14ed   :  { %s3096_s18 = scalar_lea.vmem %s2495_s15, 320  ;;  %p3101_p13 = scmp.lt.s32.totalorder %s2495_s15, %s2495_s15 }
0x14ee   :  { %p3097_p12 = scmp.ne.s32.totalorder %s2495_s15, %s3096_s18  ;;  %p3102_p0 = scmp.lt.s32.totalorder %s3096_s18, %s3096_s18 }
0x14f0   :  { %p3103_p1 = por %p3102_p0, %p3101_p13 }
0x14f2   :  { %p3104_p2 = pnand %p3103_p1, %p3097_p12 }
0x14f8   :  { %v2917_v62 = vpop.eup %2916 }
0x14f9   :  { %v1979_v3 = vmul.f32 %v2917_v62, %v1977_v2 }
0x1559   :  { %v1982_v63 = vpop.permute.xlu1 %1981 }
0x155a   :  { %v1984_v1 = vmul.f32 %v2917_v62, %v1982_v63 }
0x155c   :  { %1986 = vrot.lane.b32.xlu1 %v1984_v1, %s3187_s25 }
0x15ce   :  { %v1987_v4 = vpop.permute.xlu1 %1986 }
0x15cf   :  { %v3552_v16 = vadd.f32 %v1987_v4, %v1979_v3  ;;  %v2395_v4 = vld [vmem:[#allocation13] sm:$0xff] }
0x15d1   :  { %2918 = vtanh.f32 %v3552_v16 }
0x15de   :  { %v2919_v7 = vpop.eup %2918 }
0x15df   :  { %1992 = vrot.lane.b32.xlu0 %v2919_v7, %s3188_s10 }
0x1651   :  { %v1993_v8 = vpop.permute.xlu0 %1992 }
0x1652   :  { %v1995_v9 = vmul.f32 %v2917_v62, %v1993_v8 }
0x1654   :  { %2000 = vrot.lane.b32.xlu1 %v1995_v9, %s3189_s1 }
0x1658   :  { %2096 = vrot.lane.b32.xlu1 %v2094_v10, %s3187_s25 }
0x16c6   :  { %v2001_v11 = vpop.permute.xlu1 %2000 }
0x16c7   :  { %2257 = vst.msk [vmem:[#allocation17 + $0xe] sm:$0x3] %vm2249_vm4, %v2001_v11  ;;  %2811 = vmatmul.mubr.msk.f32.vlgmr.msra.gmra.mxu1 %vm234_vm3, %v2001_v11 }
0x16c8   :  { %2824 = vmatprep.mubr.msk.f32.mxu1 %vm3185_vm0, %v3184_v0  ;;  %2821 = vmatpush3.msk.msra.mxu1 %vm238_vm1, %v2311_v60 }
0x16c9   :  { %2822 = vmatprep.subr.mxu1 %v3184_v0 }
0x16ca   :  { %v2097_v30 = vpop.permute.xlu1 %2096  ;;  %2823 = vmatpush3.msra.mxu1 %v2310_v61 }
0x1787   :  { %v2073_v13 = vpop.f32.mrf.mxu1 }
0x1788   :  { %v2074_v17 = vadd.f32 %v2073_v13, %v3378_v33 }
0x1789   :  { %v2812_v19 = vpop.f32.mrf.mxu1 }
0x178a   :  { %v2085_v20 = vadd.f32 %v2594_v15, %v2074_v17 }
0x178c   :  { %2920 = vtanh.f32 %v2085_v20  ;;  %v2595_v22 = vmul.f32 -1.442695, %v2085_v20 }
0x178e   :  { %2922 = vpow2.f32 %v2595_v22 }
0x1799   :  { %v2921_v21 = vpop.eup %2920 }
0x179a   :  { %2101 = vrot.lane.b32.xlu0 %v2921_v21, %s3186_s4 }
0x179b   :  { %v2923_v23 = vpop.eup %2922 }
0x179c   :  { %v2089_v24 = vadd.f32 1.0, %v2923_v23 }
0x179e   :  { %2924 = vrcp.f32 %v2089_v24 }
0x17ab   :  { %v2925_v25 = vpop.eup %2924 }
0x17ac   :  { %v2099_v32 = vmul.f32 %v2925_v25, %v2097_v30 }
0x180c   :  { %v2102_v26 = vpop.permute.xlu0 %2101 }
0x180d   :  { %v2104_v28 = vmul.f32 %v2925_v25, %v2102_v26 }
0x180f   :  { %2106 = vrot.lane.b32.xlu0 %v2104_v28, %s3187_s25 }
0x1881   :  { %v2107_v34 = vpop.permute.xlu0 %2106 }
0x1882   :  { %v2109_v33 = vadd.f32 %v2107_v34, %v2099_v32 }
0x1884   :  { %2926 = vtanh.f32 %v2109_v33 }
0x1891   :  { %v2927_v37 = vpop.eup %2926 }
0x1892   :  { %2112 = vrot.lane.b32.xlu1 %v2927_v37, %s3188_s10 }
0x1904   :  { %v2113_v38 = vpop.permute.xlu1 %2112 }
0x1905   :  { %v2115_v39 = vmul.f32 %v2925_v25, %v2113_v38 }
0x1907   :  { %2120 = vrot.lane.b32.xlu0 %v2115_v39, %s3189_s1 }
0x190b   :  { %2216 = vrot.lane.b32.xlu0 %v2214_v41, %s3187_s25 }
0x1979   :  { %v2121_v42 = vpop.permute.xlu0 %2120 }
0x197a   :  { %2258 = vst.msk [vmem:[#allocation17 + $0x10] sm:$0x3] %vm2249_vm4, %v2121_v42  ;;  %2818 = vmatmul.mubr.msk.f32.vlgmr.msra.gmra.mxu0 %vm234_vm3, %v2121_v42 }
0x197b   :  { %2829 = vmatprep.mubr.msk.f32.mxu0 %vm3185_vm0, %v3184_v0  ;;  %2828 = vmatpush3.msra.mxu0 %v2395_v4 }
0x197d   :  { %v2217_v56 = vpop.permute.xlu0 %2216 }
0x1a3a   :  { %v2193_v43 = vpop.f32.mrf.mxu0 }
0x1a3b   :  { %v2194_v45 = vadd.f32 %v2193_v43, %v3448_v18 }
0x1a3c   :  { %v2819_v46 = vpop.f32.mrf.mxu0 }
0x1a3d   :  { %v2205_v47 = vadd.f32 %v2598_v44, %v2194_v45 }
0x1a3f   :  { %2928 = vtanh.f32 %v2205_v47  ;;  %v2599_v49 = vmul.f32 -1.442695, %v2205_v47 }
0x1a41   :  { %2930 = vpow2.f32 %v2599_v49 }
0x1a4c   :  { %v2929_v48 = vpop.eup %2928 }
0x1a4d   :  { %2221 = vrot.lane.b32.xlu1 %v2929_v48, %s3186_s4 }
0x1a4e   :  { %v2931_v50 = vpop.eup %2930 }
0x1a4f   :  { %v2209_v52 = vadd.f32 1.0, %v2931_v50 }
0x1a51   :  { %2932 = vrcp.f32 %v2209_v52 }
0x1a5e   :  { %v2933_v53 = vpop.eup %2932 }
0x1a5f   :  { %v2219_v57 = vmul.f32 %v2933_v53, %v2217_v56 }
0x1abf   :  { %v2222_v54 = vpop.permute.xlu1 %2221 }
0x1ac0   :  { %v2224_v55 = vmul.f32 %v2933_v53, %v2222_v54 }
0x1ac2   :  { %2226 = vrot.lane.b32.xlu1 %v2224_v55, %s3187_s25 }
0x1b34   :  { %v2227_v58 = vpop.permute.xlu1 %2226 }
0x1b35   :  { %v2229_v18 = vadd.f32 %v2227_v58, %v2219_v57 }
0x1b37   :  { %2934 = vtanh.f32 %v2229_v18 }
0x1b44   :  { %v2935_v59 = vpop.eup %2934 }
0x1b45   :  { %2232 = vrot.lane.b32.xlu0 %v2935_v59, %s3188_s10 }
0x1b49   :  { %2270 = vrot.lane.b32.xlu0 %v3387_v51, %s3190_s2 }
0x1b4d   :  { %2274 = vrot.lane.b32.xlu0 %v3472_v27, %s3190_s2 }
0x1b51   :  { %2278 = vrot.lane.b32.xlu0 %v3504_v29, %s3190_s2 }
0x1b55   :  { %2282 = vrot.lane.b32.xlu0 %v3536_v31, %s3190_s2 }
0x1b59   :  { %2286 = vrot.lane.b32.xlu0 %v2109_v33, %s3190_s2 }
0x1bb7   :  { %v2233_v51 = vpop.permute.xlu0 %2232 }
0x1bb8   :  { %v2235_v27 = vmul.f32 %v2933_v53, %v2233_v51 }
0x1bba   :  { %2237 = vrot.lane.b32.xlu1 %v2235_v27, %s3189_s1 }
0x1bbb   :  { %v2271_v62 = vpop.permute.xlu0 %2270 }
0x1bbc   :  { %2300 = vst.msk [vmem:[#allocation19] sm:$0x3] %vm2249_vm4, %v2271_v62 }
0x1bbe   :  { %2272 = vrot.lane.b32.xlu1 %v3456_v40, %s3190_s2 }
0x1bbf   :  { %v2275_v63 = vpop.permute.xlu0 %2274 }
0x1bc0   :  { %2302 = vst.msk [vmem:[#allocation19 + $0x4] sm:$0x3] %vm2249_vm4, %v2275_v63 }
0x1bc2   :  { %2276 = vrot.lane.b32.xlu1 %v3488_v12, %s3190_s2 }
0x1bc3   :  { %v2279_v0 = vpop.permute.xlu0 %2278 }
0x1bc4   :  { %2304 = vst.msk [vmem:[#allocation19 + $0x8] sm:$0x3] %vm2249_vm4, %v2279_v0 }
0x1bc6   :  { %2280 = vrot.lane.b32.xlu1 %v3520_v14, %s3190_s2 }
0x1bc7   :  { %v2283_v29 = vpop.permute.xlu0 %2282 }
0x1bc8   :  { %2306 = vst.msk [vmem:[#allocation19 + $0xc] sm:$0x3] %vm2249_vm4, %v2283_v29 }
0x1bca   :  { %2284 = vrot.lane.b32.xlu1 %v3552_v16, %s3190_s2  ;;  %v2600_v16 = vld [vmem:[#allocation11] ss:$0 sm:$0xff] }
0x1bcb   :  { %v2287_v31 = vpop.permute.xlu0 %2286 }
0x1bcc   :  { %2308 = vst.msk [vmem:[#allocation19 + $0x10] sm:$0x3] %vm2249_vm4, %v2287_v31 }
0x1bce   :  { %2288 = vrot.lane.b32.xlu1 %v2229_v18, %s3190_s2 }
0x1c2c   :  { %v2238_v40 = vpop.permute.xlu1 %2237 }
0x1c2d   :  { %2259 = vst.msk [vmem:[#allocation17 + $0x12] sm:$0x3] %vm2249_vm4, %v2238_v40  ;;  %2825 = vmatmul.mubr.msk.f32.vlgmr.msra.gmra.mxu1 %vm234_vm3, %v2238_v40 }
0x1c30   :  { %v2273_v12 = vpop.permute.xlu1 %2272 }
0x1c31   :  { %2301 = vst.msk [vmem:[#allocation19 + $0x2] sm:$0x3] %vm2249_vm4, %v2273_v12 }
0x1c34   :  { %v2277_v1 = vpop.permute.xlu1 %2276 }
0x1c35   :  { %2303 = vst.msk [vmem:[#allocation19 + $0x6] sm:$0x3] %vm2249_vm4, %v2277_v1 }
0x1c38   :  { %v2281_v14 = vpop.permute.xlu1 %2280 }
0x1c39   :  { %2305 = vst.msk [vmem:[#allocation19 + $0xa] sm:$0x3] %vm2249_vm4, %v2281_v14 }
0x1c3c   :  { %v2285_v2 = vpop.permute.xlu1 %2284 }
0x1c3d   :  { %2307 = vst.msk [vmem:[#allocation19 + $0xe] sm:$0x3] %vm2249_vm4, %v2285_v2 }
0x1c40   :  { %v2289_v3 = vpop.permute.xlu1 %2288 }
0x1c41   :  { %2309 = vst.msk [vmem:[#allocation19 + $0x12] sm:$0x3] %vm2249_vm4, %v2289_v3 }
0x1ced   :  { %v2390_v5 = vpop.f32.mrf.mxu1 }
0x1cee   :  { %v2391_v6 = vadd.f32 %v2600_v16, %v2390_v5 }
0x1cef   :  { %v2826_v7 = vpop.f32.mrf.mxu1 }
0x1cf0   :  { %v2394_v8 = vmax.f32 %v2391_v6, 0.0 }
0x1cf2   :  { %2830 = vmatmul.mubr.msk.f32.vlgmr.msra.gmra.mxu0 %vm2403_vm5, %v2394_v8 }
0x1cf3   :  { %3107 = shalt.err (!%p3104_p2)
}
0x1cf4   :  { %2500 = dma.vmem_to_hbm [thread:$0]  %s2495_s15, 320, %s3639_s13, [#allocation18], %s3171_s16, %s3171_s16, %s3172_s17  }
0x1cf5   :  { %s3192_s24 = smov [#allocation19]  }
0x1cf6   :  { %s2506_s5 = sshll.u32 %s3192_s24, 4  ;;  %s2507_s5 = int_to_ptr.vmem [resolvable:$true] %s2506_s5 }
0x1cf7   :  { %s3116_s4 = scalar_lea.vmem %s2507_s5, 320  ;;  %p3121_p4 = scmp.lt.s32.totalorder %s2507_s5, %s2507_s5 }
0x1cf8   :  { %p3117_p3 = scmp.ne.s32.totalorder %s2507_s5, %s3116_s4  ;;  %p3122_p5 = scmp.lt.s32.totalorder %s3116_s4, %s3116_s4 }
0x1cfa   :  { %p3123_p6 = por %p3122_p5, %p3121_p4 }
0x1cfc   :  { %p3124_p7 = pnand %p3123_p6, %p3117_p3 }
0x1cfe   :  { %3127 = shalt.err (!%p3124_p7)
}
0x1cff   :  { %2512 = dma.vmem_to_hbm [thread:$0]  %s2507_s5, 320, %s3640_s14, [#allocation18], %s3171_s16, %s3171_s16, %s3172_s17   ;;  %v2603_v9 = vld [vmem:[#allocation14] ss:$0 sm:$0xff]  ;;  %vm2477_vm6 = vcmask 58368  }
0x1d00   :  { %s3193_s22 = smov [#allocation16]  }
0x1d01   :  { %s2485_s13 = sshll.u32 %s3193_s22, 4  ;;  %s2486_s13 = int_to_ptr.vmem [resolvable:$true] %s2485_s13 }
0x1d02   :  { %s3136_s6 = scalar_lea.vmem %s2486_s13, 32  ;;  %p3141_p9 = scmp.lt.s32.totalorder %s2486_s13, %s2486_s13 }
0x1d03   :  { %p3137_p8 = scmp.ne.s32.totalorder %s2486_s13, %s3136_s6  ;;  %p3142_p10 = scmp.lt.s32.totalorder %s3136_s6, %s3136_s6 }
0x1d05   :  { %p3143_p11 = por %p3142_p10, %p3141_p9 }
0x1d07   :  { %p3144_p12 = pnand %p3143_p11, %p3137_p8 }
0x1db2   :  { %v2473_v10 = vpop.f32.mrf.mxu0 }
0x1db3   :  { %v2474_v11 = vadd.f32 %v2603_v9, %v2473_v10 }
0x1db4   :  { %v2831_v13 = vpop.f32.mrf.mxu0 }
0x1db5   :  { %2478 = vst.msk [vmem:[#allocation16] sm:$0x3] %vm2477_vm6, %v2474_v11 }
0x1db6   :  { %3147 = shalt.err (!%p3144_p12)
}
0x1db7   :  { %2488 = dma.vmem_to_hbm [thread:$0]  %s2486_s13, 32, %s3638_s12, [#allocation4]  }
0x1db8   :  { %3166 = dma.done.wait [#allocation4], 32  }
0x1db9   :  { %3167 = vsyncadd [#allocation4], 4294967264 }
0x1dba   :  { %3168 = dma.done.wait [#allocation18], 640  }
0x1dbb   :  { %3169 = vsyncadd [#allocation18], 4294966656 }
0x1dbc   :  { %2522 = vsyncpa [#allocation3], 1 }
0x1dbd   :  { %2523 = vsyncpa [#allocation6], 1 }
0x1dbe   :  { %2524 = vsyncpa [#allocation9], 1 }
0x1dbf   :  { %2525 = vsyncpa [#allocation12], 1 }
0x1dc0   :  { %2526 = vsyncpa [#allocation15], 1 }
0x1dc1   :  { %2527 = vsyncpa [#allocation4], 1 }
0x1dc2   :  { %2528 = vsyncpa [#allocation18], 1 }

</bundles_post_ra>
